<compile_context>
chip_gen: v7x
topology: tpu7x:2x2x1
jax: 0.10.0
libtpu: 0.0.40
codegen_flags: <defaults>
</compile_context>

<pallas_src>
import functools
import math

import jax
import jax.numpy as jnp
from jax.experimental import pallas as pl
from jax.experimental.pallas import tpu as pltpu


def _round_up(n, m):
    return ((n + m - 1) // m) * m


def _cdiv(a, b):
    return (a + b - 1) // b


def _telu(x, alpha):
    # Module's "TeLU": x if x >= 0 else alpha * (exp(x) - 1).
    # exp(min(x, 0)) keeps the discarded branch finite; selected values are
    # bit-identical to exp(x) - 1 for x < 0.
    return jnp.where(x >= 0.0, x, alpha * (jnp.exp(jnp.minimum(x, 0.0)) - 1.0))


def generator_kernel(x_ref, w1_ref, b1_ref, w2_ref, b2_ref, w3_ref, b3_ref,
                     o_ref, *, chunk_b, alpha1, alpha2):
    """x_ref / o_ref: (TILE_B, IN_F) f32 blocks, batch-major in HBM.

    Compute runs transposed -- (features, chunk_b), batch on the lane axis --
    so intermediates are lane-dense and the MXU N dimension is full.
    """
    tile_b = x_ref.shape[0]
    n_chunks = tile_b // chunk_b

    # Weights (bf16) / biases (f32 column vectors) stay VMEM-resident across
    # the whole grid (index_map -> (0, 0)); read them once per invocation.
    w1 = w1_ref[...]
    w2 = w2_ref[...]
    w3 = w3_ref[...]
    b1 = b1_ref[...]
    b2 = b2_ref[...]
    b3 = b3_ref[...]

    for c in range(n_chunks):  # static chunk loop over batch (lane) columns
        lo = c * chunk_b
        xs = x_ref[lo:lo + chunk_b, :]                  # (chunk_b, IN_F) f32
        x_t = xs.T.astype(jnp.bfloat16)                 # XLU -> (IN_F, chunk_b)

        h1 = jnp.dot(w1, x_t, preferred_element_type=jnp.float32) + b1
        h1 = _telu(h1, alpha1)                          # (64, chunk_b) f32

        h2 = jnp.dot(w2, h1.astype(jnp.bfloat16),
                     preferred_element_type=jnp.float32) + b2
        h2 = _telu(h2, alpha2)                          # (32, chunk_b) f32

        h3 = jnp.dot(w3, h2.astype(jnp.bfloat16),
                     preferred_element_type=jnp.float32) + b3  # (IN_F, chunk_b)

        # Transpose back on the XLU and store the batch-major slab.
        o_ref[lo:lo + chunk_b, :] = h3.T.astype(o_ref.dtype)


def generator_forward(x, params, max_tile_b=8192):
    """Fused generator forward. x: (batch, input_size) float32, batch-major."""
    w1, b1, w2, b2, w3, b3 = params
    batch, in_f = x.shape
    h1_f, h2_f = w1.shape[0], w2.shape[0]  # 64, 32

    # --- batch tiling -----------------------------------------------------
    # Pad the batch to a multiple of 512 only (bounded padding waste), then
    # split into tiles: at least 2 grid steps whenever there is enough work
    # so ("parallel",) can feed both v7x TensorCores.
    padded = _round_up(max(batch, 512), 512)
    min_tiles = 2 if padded >= 1024 else 1
    num_tiles = max(_cdiv(padded, max_tile_b), min_tiles)
    tile_b = _round_up(_cdiv(padded, num_tiles), 512)
    padded = num_tiles * tile_b
    chunk_b = 1024 if tile_b % 1024 == 0 else 512

    if padded != batch:
        # Row padding only (no transpose). Callers with batch % 512 == 0 and
        # >= 2 tiles pay nothing here.
        x = jnp.pad(x, ((0, padded - batch), (0, 0)))

    # --- parameter staging --------------------------------------------------
    # Weights as bf16 (MXU-native operands); biases as f32 column vectors so
    # "W @ x_t + b" broadcasts along the lane (batch) axis.
    w1b = w1.astype(jnp.bfloat16)
    w2b = w2.astype(jnp.bfloat16)
    w3b = w3.astype(jnp.bfloat16)
    b1c = b1.reshape(h1_f, 1).astype(jnp.float32)
    b2c = b2.reshape(h2_f, 1).astype(jnp.float32)
    b3c = b3.reshape(in_f, 1).astype(jnp.float32)

    kernel = functools.partial(generator_kernel, chunk_b=chunk_b,
                               alpha1=0.15, alpha2=0.1)

    flops = 2 * padded * (in_f * h1_f + h1_f * h2_f + h2_f * in_f)
    transcendentals = padded * (h1_f + h2_f)
    bytes_accessed = (
        padded * in_f * 4 * 2                     # read x tiles, write out tiles
        + 2 * (w1.size + w2.size + w3.size)       # bf16 weights
        + 4 * (b1.size + b2.size + b3.size)       # f32 biases
    )

    out = pl.pallas_call(
        kernel,
        out_shape=jax.ShapeDtypeStruct((padded, in_f), jnp.float32),
        grid=(num_tiles,),
        in_specs=[
            # streamed per-tile input: (TILE_B, IN_F), batch-major
            pl.BlockSpec((tile_b, in_f), lambda i: (i, 0)),
            # weights / biases: resident in VMEM across all grid steps
            pl.BlockSpec((h1_f, in_f), lambda i: (0, 0)),
            pl.BlockSpec((h1_f, 1), lambda i: (0, 0)),
            pl.BlockSpec((h2_f, h1_f), lambda i: (0, 0)),
            pl.BlockSpec((h2_f, 1), lambda i: (0, 0)),
            pl.BlockSpec((in_f, h2_f), lambda i: (0, 0)),
            pl.BlockSpec((in_f, 1), lambda i: (0, 0)),
        ],
        out_specs=pl.BlockSpec((tile_b, in_f), lambda i: (i, 0)),
        compiler_params=pltpu.CompilerParams(
            dimension_semantics=("parallel",),
            # ~20 MiB live at tile_b=8192 (lane-padded in/out blocks included);
            # 32 MiB is safe on v5e (128 MiB phys), v6e (128) and v7x (64).
            vmem_limit_bytes=32 * 1024 * 1024,
        ),
        cost_estimate=pl.CostEstimate(
            flops=flops,
            transcendentals=transcendentals,
            bytes_accessed=bytes_accessed,
        ),
    )(x, w1b, b1c, w2b, b2c, w3b, b3c)

    return out if padded == batch else out[:batch]


def init_generator_params(key, input_size):
    """Deterministic init mimicking nn.Linear (uniform +/- 1/sqrt(fan_in)).

    Weights in PyTorch layout (out, in); biases as (out,) vectors.
    """
    def linear(key, fan_in, fan_out):
        kw, kb = jax.random.split(key)
        bound = 1.0 / math.sqrt(fan_in)
        w = jax.random.uniform(kw, (fan_out, fan_in), jnp.float32, -bound, bound)
        b = jax.random.uniform(kb, (fan_out,), jnp.float32, -bound, bound)
        return w, b

    k1, k2, k3 = jax.random.split(key, 3)
    w1, b1 = linear(k1, input_size, 64)
    w2, b2 = linear(k2, 64, 32)
    w3, b3 = linear(k3, 32, input_size)
    return (w1, b1, w2, b2, w3, b3)


def generator_reference(x, params):
    """Pure-JAX f32 reference (batch-major, PyTorch-style)."""
    w1, b1, w2, b2, w3, b3 = params
    h = x @ w1.T + b1
    h = jnp.where(h >= 0, h, 0.15 * (jnp.exp(h) - 1.0))
    h = h @ w2.T + b2
    h = jnp.where(h >= 0, h, 0.1 * (jnp.exp(h) - 1.0))
    return h @ w3.T + b3


if __name__ == "__main__":
    key = jax.random.PRNGKey(0)
    kx, kp = jax.random.split(key)

    batch = 8
    input_size = 16  # matches the Generator(input_size) constructor argument

    x = jax.random.normal(kx, (batch, input_size), jnp.float32)
    params = init_generator_params(kp, input_size)

    out = generator_forward(x, params)
    out = jax.block_until_ready(out)

    ref = generator_reference(x, params)
    assert out.shape == (batch, input_size)
    # bf16 MXU operands (f32 accumulation) -> slightly looser tolerance.
    assert jnp.allclose(out, ref, atol=5e-2, rtol=5e-2), "mismatch vs reference"

    print("KERNEL_OK")
</pallas_src>

<mosaic_0001>
module attributes {stable_mosaic.version = 11 : i64} {
  func.func @generator_kernel(%arg0: i32, %arg1: memref<512x16xf32, #tpu.memory_space<vmem>>, %arg2: memref<64x16xbf16, #tpu.memory_space<vmem>>, %arg3: memref<64x1xf32, #tpu.memory_space<vmem>>, %arg4: memref<32x64xbf16, #tpu.memory_space<vmem>>, %arg5: memref<32x1xf32, #tpu.memory_space<vmem>>, %arg6: memref<16x32xbf16, #tpu.memory_space<vmem>>, %arg7: memref<16x1xf32, #tpu.memory_space<vmem>>, %arg8: memref<512x16xf32, #tpu.memory_space<vmem>>) attributes {dimension_semantics = [#tpu.dimension_semantics<parallel>], iteration_bounds = array<i64: 1>, scalar_prefetch = 0 : i64, scratch_operands = 0 : i64, tpu.core_type = #tpu.core_type<tc>, window_params = [{transform_indices = @transform_0, window_bounds = array<i64: 512, 16>}, {pipeline_mode = #tpu.pipeline_mode<synchronous>, transform_indices = @transform_1, window_bounds = array<i64: 64, 16>}, {pipeline_mode = #tpu.pipeline_mode<synchronous>, transform_indices = @transform_2, window_bounds = array<i64: 64, 1>}, {pipeline_mode = #tpu.pipeline_mode<synchronous>, transform_indices = @transform_3, window_bounds = array<i64: 32, 64>}, {pipeline_mode = #tpu.pipeline_mode<synchronous>, transform_indices = @transform_4, window_bounds = array<i64: 32, 1>}, {pipeline_mode = #tpu.pipeline_mode<synchronous>, transform_indices = @transform_5, window_bounds = array<i64: 16, 32>}, {pipeline_mode = #tpu.pipeline_mode<synchronous>, transform_indices = @transform_6, window_bounds = array<i64: 16, 1>}, {transform_indices = @transform_7, window_bounds = array<i64: 512, 16>}]} {
    %c0 = arith.constant 0 : index
    %c0_0 = arith.constant 0 : index
    %0 = vector.load %arg2[%c0, %c0_0] : memref<64x16xbf16, #tpu.memory_space<vmem>>, vector<64x16xbf16>
    %c0_1 = arith.constant 0 : index
    %c0_2 = arith.constant 0 : index
    %1 = vector.load %arg4[%c0_1, %c0_2] : memref<32x64xbf16, #tpu.memory_space<vmem>>, vector<32x64xbf16>
    %c0_3 = arith.constant 0 : index
    %c0_4 = arith.constant 0 : index
    %2 = vector.load %arg6[%c0_3, %c0_4] : memref<16x32xbf16, #tpu.memory_space<vmem>>, vector<16x32xbf16>
    %c0_5 = arith.constant 0 : index
    %c0_6 = arith.constant 0 : index
    %3 = vector.load %arg3[%c0_5, %c0_6] : memref<64x1xf32, #tpu.memory_space<vmem>>, vector<64x1xf32>
    %c0_7 = arith.constant 0 : index
    %c0_8 = arith.constant 0 : index
    %4 = vector.load %arg5[%c0_7, %c0_8] : memref<32x1xf32, #tpu.memory_space<vmem>>, vector<32x1xf32>
    %c0_9 = arith.constant 0 : index
    %c0_10 = arith.constant 0 : index
    %5 = vector.load %arg7[%c0_9, %c0_10] : memref<16x1xf32, #tpu.memory_space<vmem>>, vector<16x1xf32>
    %c0_11 = arith.constant 0 : index
    %c0_12 = arith.constant 0 : index
    %6 = vector.load %arg1[%c0_11, %c0_12] : memref<512x16xf32, #tpu.memory_space<vmem>>, vector<512x16xf32>
    %7 = tpu.transpose %6, [1, 0] : vector<512x16xf32> -> vector<16x512xf32>
    %8 = arith.truncf %7 : vector<16x512xf32> to vector<16x512xbf16>
    %cst = arith.constant dense<0.000000e+00> : vector<64x512xf32>
    %9 = tpu.matmul %0, %8, %cst {dimension_numbers = #tpu.dot_dimension_numbers<[1], [0], [0], [1], [0, 0, 1, 1], [], []>} : vector<64x16xbf16>, vector<16x512xbf16>, vector<64x512xf32> -> vector<64x512xf32>
    %10 = vector.broadcast %3 : vector<64x1xf32> to vector<64x512xf32>
    %11 = arith.addf %9, %10 : vector<64x512xf32>
    %cst_13 = arith.constant 0.000000e+00 : f32
    %12 = vector.broadcast %cst_13 : f32 to vector<64x512xf32>
    %13 = arith.cmpf oge, %11, %12 : vector<64x512xf32>
    %cst_14 = arith.constant 0.000000e+00 : f32
    %14 = vector.broadcast %cst_14 : f32 to vector<64x512xf32>
    %15 = arith.minimumf %11, %14 : vector<64x512xf32>
    %16 = math.exp %15 : vector<64x512xf32>
    %cst_15 = arith.constant 1.000000e+00 : f32
    %17 = vector.broadcast %cst_15 : f32 to vector<64x512xf32>
    %18 = arith.subf %16, %17 : vector<64x512xf32>
    %cst_16 = arith.constant 1.500000e-01 : f32
    %19 = vector.broadcast %cst_16 : f32 to vector<64x512xf32>
    %20 = arith.mulf %19, %18 : vector<64x512xf32>
    %21 = arith.select %13, %11, %20 : vector<64x512xi1>, vector<64x512xf32>
    %22 = arith.truncf %21 : vector<64x512xf32> to vector<64x512xbf16>
    %cst_17 = arith.constant dense<0.000000e+00> : vector<32x512xf32>
    %23 = tpu.matmul %1, %22, %cst_17 {dimension_numbers = #tpu.dot_dimension_numbers<[1], [0], [0], [1], [0, 0, 1, 1], [], []>} : vector<32x64xbf16>, vector<64x512xbf16>, vector<32x512xf32> -> vector<32x512xf32>
    %24 = vector.broadcast %4 : vector<32x1xf32> to vector<32x512xf32>
    %25 = arith.addf %23, %24 : vector<32x512xf32>
    %cst_18 = arith.constant 0.000000e+00 : f32
    %26 = vector.broadcast %cst_18 : f32 to vector<32x512xf32>
    %27 = arith.cmpf oge, %25, %26 : vector<32x512xf32>
    %cst_19 = arith.constant 0.000000e+00 : f32
    %28 = vector.broadcast %cst_19 : f32 to vector<32x512xf32>
    %29 = arith.minimumf %25, %28 : vector<32x512xf32>
    %30 = math.exp %29 : vector<32x512xf32>
    %cst_20 = arith.constant 1.000000e+00 : f32
    %31 = vector.broadcast %cst_20 : f32 to vector<32x512xf32>
    %32 = arith.subf %30, %31 : vector<32x512xf32>
    %cst_21 = arith.constant 1.000000e-01 : f32
    %33 = vector.broadcast %cst_21 : f32 to vector<32x512xf32>
    %34 = arith.mulf %33, %32 : vector<32x512xf32>
    %35 = arith.select %27, %25, %34 : vector<32x512xi1>, vector<32x512xf32>
    %36 = arith.truncf %35 : vector<32x512xf32> to vector<32x512xbf16>
    %cst_22 = arith.constant dense<0.000000e+00> : vector<16x512xf32>
    %37 = tpu.matmul %2, %36, %cst_22 {dimension_numbers = #tpu.dot_dimension_numbers<[1], [0], [0], [1], [0, 0, 1, 1], [], []>} : vector<16x32xbf16>, vector<32x512xbf16>, vector<16x512xf32> -> vector<16x512xf32>
    %38 = vector.broadcast %5 : vector<16x1xf32> to vector<16x512xf32>
    %39 = arith.addf %37, %38 : vector<16x512xf32>
    %40 = tpu.transpose %39, [1, 0] : vector<16x512xf32> -> vector<512x16xf32>
    %c0_23 = arith.constant 0 : index
    %c0_24 = arith.constant 0 : index
    %41 = vector.load %arg8[%c0_23, %c0_24] : memref<512x16xf32, #tpu.memory_space<vmem>>, vector<512x16xf32>
    tpu.vector_store %arg8[%c0_23, %c0_24], %40 {strides = array<i32>} : memref<512x16xf32, #tpu.memory_space<vmem>>, vector<512x16xf32>,
    return
  }
  func.func @transform_0(%arg0: i32) -> (i32, i32) {
    %c0_i32 = arith.constant 0 : i32
    %c0_i32_0 = arith.constant 0 : i32
    return %arg0, %c0_i32 : i32, i32
  }
  func.func @transform_1(%arg0: i32) -> (i32, i32) {
    %c0_i32 = arith.constant 0 : i32
    %c0_i32_0 = arith.constant 0 : i32
    %c0_i32_1 = arith.constant 0 : i32
    return %c0_i32, %c0_i32_0 : i32, i32
  }
  func.func @transform_2(%arg0: i32) -> (i32, i32) {
    %c0_i32 = arith.constant 0 : i32
    %c0_i32_0 = arith.constant 0 : i32
    %c0_i32_1 = arith.constant 0 : i32
    return %c0_i32, %c0_i32_0 : i32, i32
  }
  func.func @transform_3(%arg0: i32) -> (i32, i32) {
    %c0_i32 = arith.constant 0 : i32
    %c0_i32_0 = arith.constant 0 : i32
    %c0_i32_1 = arith.constant 0 : i32
    return %c0_i32, %c0_i32_0 : i32, i32
  }
  func.func @transform_4(%arg0: i32) -> (i32, i32) {
    %c0_i32 = arith.constant 0 : i32
    %c0_i32_0 = arith.constant 0 : i32
    %c0_i32_1 = arith.constant 0 : i32
    return %c0_i32, %c0_i32_0 : i32, i32
  }
  func.func @transform_5(%arg0: i32) -> (i32, i32) {
    %c0_i32 = arith.constant 0 : i32
    %c0_i32_0 = arith.constant 0 : i32
    %c0_i32_1 = arith.constant 0 : i32
    return %c0_i32, %c0_i32_0 : i32, i32
  }
  func.func @transform_6(%arg0: i32) -> (i32, i32) {
    %c0_i32 = arith.constant 0 : i32
    %c0_i32_0 = arith.constant 0 : i32
    %c0_i32_1 = arith.constant 0 : i32
    return %c0_i32, %c0_i32_0 : i32, i32
  }
  func.func @transform_7(%arg0: i32) -> (i32, i32) {
    %c0_i32 = arith.constant 0 : i32
    %c0_i32_0 = arith.constant 0 : i32
    return %arg0, %c0_i32 : i32, i32
  }
}

</mosaic_0001>

<bundles_post_ra>
// kernel: tpu_custom_call.1
= control target key start
LH: loop header
LB: loop body
LE: loop exit
PB: predicated region body
PF: predicated region fallthrough
CT: control target
= control target key end

     0   :  { %v1534_v28 = vmov 0   ;;  %vm311_vm0 = vcmask 130048   ;;  %s2527_s0 = inlined_call_operand.vmem [shape: f32[512,16], index: 0, kind: input, shape index: {}]   ;;  %s2528_s1 = inlined_call_operand.vmem [shape: bf16[64,16], index: 1, kind: input, shape index: {}]   ;;  %s2529_s2 = inlined_call_operand.vmem [shape: f32[64,1], index: 2, kind: input, shape index: {}]   ;;  %s2530_s4 = inlined_call_operand.vmem [shape: f32[32,1], index: 4, kind: input, shape index: {}]   ;;  %s2531_s6 = inlined_call_operand.vmem [shape: f32[16,1], index: 6, kind: input, shape index: {}]   ;;  %s2532_s3 = inlined_call_operand.vmem [shape: bf16[32,64], index: 3, kind: input, shape index: {}]   ;;  %s2533_s5 = inlined_call_operand.vmem [shape: bf16[16,32], index: 5, kind: input, shape index: {}]   ;;  %s2534_s7 = inlined_call_operand.vmem [shape: f32[512,16], index: 7, kind: output, shape index: {}]  }
   0x1   :  { %v71_v0 = vld [vmem:[%s2527_s0 + $0x80] sm:$0xff]  ;;  %v72_v5 = vld [vmem:[%s2527_s0 + $0x88] sm:$0xff]  ;;  %v73_v12 = vld [vmem:[%s2527_s0 + $0x90] sm:$0xff]  ;;  %356 = vmatprep.mubr.bf16.mxu0 %v1534_v28  ;;  %429 = vmatprep.mubr.bf16.mxu1 %v1534_v28 }
   0x2   :  { %v103_v1 = vld [vmem:[%s2527_s0 + $0x180] sm:$0xff]  ;;  %v104_v6 = vld [vmem:[%s2527_s0 + $0x188] sm:$0xff]  ;;  %v105_v13 = vld [vmem:[%s2527_s0 + $0x190] sm:$0xff] }
   0x3   :  { %v55_v2 = vld [vmem:[%s2527_s0] sm:$0xff]  ;;  %v1345_v3 = vpack.i.bf16 %v103_v1, %v71_v0  ;;  %v56_v8 = vld [vmem:[%s2527_s0 + $0x8] sm:$0xff]  ;;  %v1347_v10 = vpack.i.bf16 %v104_v6, %v72_v5  ;;  %v57_v14 = vld [vmem:[%s2527_s0 + $0x10] sm:$0xff]  ;;  %v1349_v16 = vpack.i.bf16 %v105_v13, %v73_v12 }
   0x4   :  { %v87_v4 = vld [vmem:[%s2527_s0 + $0x100] sm:$0xff]  ;;  %v88_v9 = vld [vmem:[%s2527_s0 + $0x108] sm:$0xff]  ;;  %v89_v15 = vld [vmem:[%s2527_s0 + $0x110] sm:$0xff] }
   0x5   :  { %v1387_v7 = vpack.i.bf16 %v87_v4, %v55_v2  ;;  %1346 = vxpose.xlu0.b32.start [1/16] (narrow) %v1345_v3, 16  ;;  %v1389_v11 = vpack.i.bf16 %v88_v9, %v56_v8  ;;  %v1391_v17 = vpack.i.bf16 %v89_v15, %v57_v14  ;;  %v74_v18 = vld [vmem:[%s2527_s0 + $0x98] sm:$0xff]  ;;  %v75_v24 = vld [vmem:[%s2527_s0 + $0xa0] sm:$0xff]  ;;  %v76_v31 = vld [vmem:[%s2527_s0 + $0xa8] sm:$0xff] }
   0x6   :  { %v106_v19 = vld [vmem:[%s2527_s0 + $0x198] sm:$0xff]  ;;  %v107_v25 = vld [vmem:[%s2527_s0 + $0x1a0] sm:$0xff]  ;;  %v108_v32 = vld [vmem:[%s2527_s0 + $0x1a8] sm:$0xff] }
   0x7   :  { %1388 = vxpose.xlu1.b32.start [1/16] (narrow) %v1387_v7, 16  ;;  %v58_v20 = vld [vmem:[%s2527_s0 + $0x18] sm:$0xff]  ;;  %v1351_v22 = vpack.i.bf16 %v106_v19, %v74_v18  ;;  %v59_v26 = vld [vmem:[%s2527_s0 + $0x20] sm:$0xff]  ;;  %v1353_v29 = vpack.i.bf16 %v107_v25, %v75_v24  ;;  %v60_v33 = vld [vmem:[%s2527_s0 + $0x28] sm:$0xff]  ;;  %v1355_v35 = vpack.i.bf16 %v108_v32, %v76_v31 }
   0x8   :  { %v90_v21 = vld [vmem:[%s2527_s0 + $0x118] sm:$0xff]  ;;  %v91_v27 = vld [vmem:[%s2527_s0 + $0x120] sm:$0xff]  ;;  %v92_v34 = vld [vmem:[%s2527_s0 + $0x128] sm:$0xff] }
   0x9   :  { %1348 = vxpose.xlu0.b32.cont [2/16] (narrow) %v1347_v10, 16  ;;  %v1393_v23 = vpack.i.bf16 %v90_v21, %v58_v20  ;;  %v1395_v30 = vpack.i.bf16 %v91_v27, %v59_v26  ;;  %v1397_v36 = vpack.i.bf16 %v92_v34, %v60_v33  ;;  %v77_v37 = vld [vmem:[%s2527_s0 + $0xb0] sm:$0xff]  ;;  %v78_v42 = vld [vmem:[%s2527_s0 + $0xb8] sm:$0xff]  ;;  %v79_v49 = vld [vmem:[%s2527_s0 + $0xc0] sm:$0xff] }
   0xa   :  { %v109_v38 = vld [vmem:[%s2527_s0 + $0x1b0] sm:$0xff]  ;;  %v110_v44 = vld [vmem:[%s2527_s0 + $0x1b8] sm:$0xff]  ;;  %v111_v50 = vld [vmem:[%s2527_s0 + $0x1c0] sm:$0xff] }
   0xb   :  { %1390 = vxpose.xlu1.b32.cont [2/16] (narrow) %v1389_v11, 16  ;;  %v61_v39 = vld [vmem:[%s2527_s0 + $0x30] sm:$0xff]  ;;  %v1357_v41 = vpack.i.bf16 %v109_v38, %v77_v37  ;;  %v62_v45 = vld [vmem:[%s2527_s0 + $0x38] sm:$0xff]  ;;  %v1359_v47 = vpack.i.bf16 %v110_v44, %v78_v42  ;;  %v63_v51 = vld [vmem:[%s2527_s0 + $0x40] sm:$0xff]  ;;  %v1361_v53 = vpack.i.bf16 %v111_v50, %v79_v49 }
   0xc   :  { %v93_v40 = vld [vmem:[%s2527_s0 + $0x130] sm:$0xff]  ;;  %v94_v46 = vld [vmem:[%s2527_s0 + $0x138] sm:$0xff]  ;;  %v95_v52 = vld [vmem:[%s2527_s0 + $0x140] sm:$0xff] }
   0xd   :  { %1350 = vxpose.xlu0.b32.cont [3/16] (narrow) %v1349_v16, 16  ;;  %v1399_v43 = vpack.i.bf16 %v93_v40, %v61_v39  ;;  %v1401_v48 = vpack.i.bf16 %v94_v46, %v62_v45  ;;  %v1403_v54 = vpack.i.bf16 %v95_v52, %v63_v51  ;;  %v80_v55 = vld [vmem:[%s2527_s0 + $0xc8] sm:$0xff]  ;;  %v81_v61 = vld [vmem:[%s2527_s0 + $0xd0] sm:$0xff]  ;;  %v82_v3 = vld [vmem:[%s2527_s0 + $0xd8] sm:$0xff] }
   0xe   :  { %v112_v56 = vld [vmem:[%s2527_s0 + $0x1c8] sm:$0xff]  ;;  %v113_v62 = vld [vmem:[%s2527_s0 + $0x1d0] sm:$0xff]  ;;  %v114_v4 = vld [vmem:[%s2527_s0 + $0x1d8] sm:$0xff] }
   0xf   :  { %1392 = vxpose.xlu1.b32.cont [3/16] (narrow) %v1391_v17, 16  ;;  %v64_v57 = vld [vmem:[%s2527_s0 + $0x48] sm:$0xff]  ;;  %v1363_v59 = vpack.i.bf16 %v112_v56, %v80_v55  ;;  %v65_v63 = vld [vmem:[%s2527_s0 + $0x50] sm:$0xff]  ;;  %v1365_v1 = vpack.i.bf16 %v113_v62, %v81_v61  ;;  %v66_v5 = vld [vmem:[%s2527_s0 + $0x58] sm:$0xff]  ;;  %v1367_v7 = vpack.i.bf16 %v114_v4, %v82_v3 }
  0x10   :  { %v96_v58 = vld [vmem:[%s2527_s0 + $0x148] sm:$0xff]  ;;  %v97_v0 = vld [vmem:[%s2527_s0 + $0x150] sm:$0xff]  ;;  %v98_v6 = vld [vmem:[%s2527_s0 + $0x158] sm:$0xff] }
  0x11   :  { %1352 = vxpose.xlu0.b32.cont [4/16] (narrow) %v1351_v22, 16  ;;  %v1405_v60 = vpack.i.bf16 %v96_v58, %v64_v57  ;;  %v1407_v2 = vpack.i.bf16 %v97_v0, %v65_v63  ;;  %v1409_v8 = vpack.i.bf16 %v98_v6, %v66_v5  ;;  %v83_v9 = vld [vmem:[%s2527_s0 + $0xe0] sm:$0xff]  ;;  %v84_v15 = vld [vmem:[%s2527_s0 + $0xe8] sm:$0xff]  ;;  %v85_v21 = vld [vmem:[%s2527_s0 + $0xf0] sm:$0xff] }
  0x12   :  { %v115_v10 = vld [vmem:[%s2527_s0 + $0x1e0] sm:$0xff]  ;;  %v116_v16 = vld [vmem:[%s2527_s0 + $0x1e8] sm:$0xff]  ;;  %v117_v22 = vld [vmem:[%s2527_s0 + $0x1f0] sm:$0xff] }
  0x13   :  { %1394 = vxpose.xlu1.b32.cont [4/16] (narrow) %v1393_v23, 16  ;;  %v67_v11 = vld [vmem:[%s2527_s0 + $0x60] sm:$0xff]  ;;  %v1369_v13 = vpack.i.bf16 %v115_v10, %v83_v9  ;;  %v68_v17 = vld [vmem:[%s2527_s0 + $0x68] sm:$0xff]  ;;  %v1371_v19 = vpack.i.bf16 %v116_v16, %v84_v15  ;;  %v69_v23 = vld [vmem:[%s2527_s0 + $0x70] sm:$0xff]  ;;  %v1373_v25 = vpack.i.bf16 %v117_v22, %v85_v21 }
  0x14   :  { %v99_v12 = vld [vmem:[%s2527_s0 + $0x160] sm:$0xff]  ;;  %v100_v18 = vld [vmem:[%s2527_s0 + $0x168] sm:$0xff]  ;;  %v101_v24 = vld [vmem:[%s2527_s0 + $0x170] sm:$0xff] }
  0x15   :  { %1354 = vxpose.xlu0.b32.cont [5/16] (narrow) %v1353_v29, 16  ;;  %v1411_v14 = vpack.i.bf16 %v99_v12, %v67_v11  ;;  %v1413_v20 = vpack.i.bf16 %v100_v18, %v68_v17  ;;  %v1415_v26 = vpack.i.bf16 %v101_v24, %v69_v23  ;;  %v86_v27 = vld [vmem:[%s2527_s0 + $0xf8] sm:$0xff]  ;;  %v42_v34 = vld [vmem:[%s2529_s2 + $0x8] sm:$0xff]  ;;  %v41_v37 = vld [vmem:[%s2529_s2] sm:$0xff] }
  0x16   :  { %v118_v29 = vld [vmem:[%s2527_s0 + $0x1f8] sm:$0xff]  ;;  %v45_v38 = vld [vmem:[%s2529_s2 + $0x20] sm:$0xff]  ;;  %v46_v39 = vld [vmem:[%s2529_s2 + $0x28] sm:$0xff] }
  0x17   :  { %1396 = vxpose.xlu1.b32.cont [5/16] (narrow) %v1395_v30, 16  ;;  %v70_v30 = vld [vmem:[%s2527_s0 + $0x78] sm:$0xff]  ;;  %v1375_v32 = vpack.i.bf16 %v118_v29, %v86_v27  ;;  %v47_v40 = vld [vmem:[%s2529_s2 + $0x30] sm:$0xff]  ;;  %v49_v42 = vld [vmem:[%s2530_s4] sm:$0xff] }
  0x18   :  { %v102_v31 = vld [vmem:[%s2527_s0 + $0x178] sm:$0xff]  ;;  %v51_v44 = vld [vmem:[%s2530_s4 + $0x10] sm:$0xff]  ;;  %v53_v46 = vld [vmem:[%s2531_s6] sm:$0xff] }
  0x19   :  { %1356 = vxpose.xlu0.b32.cont [6/16] (narrow) %v1355_v35, 16  ;;  %v1417_v33 = vpack.i.bf16 %v102_v31, %v70_v30  ;;  %v43_v35 = vld [vmem:[%s2529_s2 + $0x10] sm:$0xff]  ;;  %v52_v45 = vld [vmem:[%s2530_s4 + $0x18] sm:$0xff]  ;;  %v1431_v0 = vld [vmem:[%s2528_s1] sm:$0xff]  }
  0x1a   :  { %v1434_v3 = vld [vmem:[%s2528_s1 + $0x18] sm:$0xff]  }
  0x1b   :  { %1398 = vxpose.xlu1.b32.cont [6/16] (narrow) %v1397_v36, 16  ;;  %v44_v36 = vld [vmem:[%s2529_s2 + $0x18] sm:$0xff] }
  0x1d   :  { %1358 = vxpose.xlu0.b32.cont [7/16] (narrow) %v1357_v41, 16  ;;  %v48_v41 = vld [vmem:[%s2529_s2 + $0x38] sm:$0xff] }
  0x1f   :  { %1400 = vxpose.xlu1.b32.cont [7/16] (narrow) %v1399_v43, 16  ;;  %v50_v43 = vld [vmem:[%s2530_s4 + $0x8] sm:$0xff] }
  0x21   :  { %1360 = vxpose.xlu0.b32.cont [8/16] (narrow) %v1359_v47, 16  ;;  %v54_v47 = vld [vmem:[%s2531_s6 + $0x8] sm:$0xff] }
  0x23   :  { %1402 = vxpose.xlu1.b32.cont [8/16] (narrow) %v1401_v48, 16 }
  0x25   :  { %1362 = vxpose.xlu0.b32.cont [9/16] (narrow) %v1361_v53, 16 }
  0x27   :  { %1404 = vxpose.xlu1.b32.cont [9/16] (narrow) %v1403_v54, 16 }
  0x29   :  { %1364 = vxpose.xlu0.b32.cont [10/16] (narrow) %v1363_v59, 16 }
  0x2b   :  { %1406 = vxpose.xlu1.b32.cont [10/16] (narrow) %v1405_v60, 16 }
  0x2d   :  { %1366 = vxpose.xlu0.b32.cont [11/16] (narrow) %v1365_v1, 16  ;;  %v1432_v1 = vld [vmem:[%s2528_s1 + $0x8] sm:$0xff]  }
  0x2f   :  { %1408 = vxpose.xlu1.b32.cont [11/16] (narrow) %v1407_v2, 16  ;;  %v1433_v2 = vld [vmem:[%s2528_s1 + $0x10] sm:$0xff]  }
  0x31   :  { %1368 = vxpose.xlu0.b32.cont [12/16] (narrow) %v1367_v7, 16 }
  0x33   :  { %1410 = vxpose.xlu1.b32.cont [12/16] (narrow) %v1409_v8, 16 }
  0x35   :  { %1370 = vxpose.xlu0.b32.cont [13/16] (narrow) %v1369_v13, 16 }
  0x37   :  { %1412 = vxpose.xlu1.b32.cont [13/16] (narrow) %v1411_v14, 16 }
  0x39   :  { %1372 = vxpose.xlu0.b32.cont [14/16] (narrow) %v1371_v19, 16 }
  0x3b   :  { %1414 = vxpose.xlu1.b32.cont [14/16] (narrow) %v1413_v20, 16 }
  0x3d   :  { %1374 = vxpose.xlu0.b32.cont [15/16] (narrow) %v1373_v25, 16 }
  0x3f   :  { %1416 = vxpose.xlu1.b32.cont [15/16] (narrow) %v1415_v26, 16 }
  0x41   :  { %1376 = vxpose.xlu0.b32.end [16/16] (narrow) %v1375_v32, 16 }
  0x43   :  { %1418 = vxpose.xlu1.b32.end [16/16] (narrow) %v1417_v33, 16 }
  0x61   :  { %1430 = vset.pattern.permute.xlu1 %v1534_v28 }
  0x62   :  { %258 = vperm.xlu1 %1430, %v42_v34  }
  0x66   :  { %263 = vperm.xlu1 %1430, %v43_v35  }
  0x6a   :  { %268 = vperm.xlu1 %1430, %v44_v36   ;;  %1429 = vset.pattern.permute.xlu0 %v1534_v28 }
  0x6b   :  { %253 = vperm.xlu0 %1429, %v41_v37  }
  0x6e   :  { %273 = vperm.xlu1 %1430, %v45_v38  }
  0x6f   :  { %278 = vperm.xlu0 %1429, %v46_v39  }
  0x72   :  { %283 = vperm.xlu1 %1430, %v47_v40  }
  0x73   :  { %288 = vperm.xlu0 %1429, %v48_v41  }
  0x76   :  { %712 = vperm.xlu1 %1430, %v49_v42  }
  0x77   :  { %717 = vperm.xlu0 %1429, %v50_v43  }
  0x7a   :  { %722 = vperm.xlu1 %1430, %v51_v44  }
  0x7b   :  { %727 = vperm.xlu0 %1429, %v52_v45  }
  0x7e   :  { %975 = vperm.xlu1 %1430, %v53_v46  }
  0x7f   :  { %980 = vperm.xlu0 %1429, %v54_v47  }
  0x85   :  { %v1377_v48 = vpop.trf.xlu0 }
  0x86   :  { %v1378_v51 = vunpack.i.l.bf16 %v1377_v48  ;;  %v1381_v52 = vunpack.i.h.bf16 %v1377_v48 }
  0x87   :  { %v1419_v49 = vpop.trf.xlu1 }
  0x88   :  { %v1420_v53 = vunpack.i.l.bf16 %v1419_v49  ;;  %v1423_v54 = vunpack.i.h.bf16 %v1419_v49 }
  0x89   :  { %v1382_v50 = vpop.trf.xlu0 }
  0x8a   :  { %v1383_v56 = vunpack.i.l.bf16 %v1382_v50  ;;  %v1386_v57 = vunpack.i.h.bf16 %v1382_v50 }
  0x8b   :  { %v1424_v55 = vpop.trf.xlu1 }
  0x8c   :  { %v1425_v58 = vunpack.i.l.bf16 %v1424_v55  ;;  %v1428_v59 = vunpack.i.h.bf16 %v1424_v55  ;;  %v248_v60 = vpack.c.bf16 %v1383_v56, %v1378_v51  ;;  %v250_v61 = vpack.c.bf16 %v1386_v57, %v1381_v52 }
  0x8e   :  { %v247_v62 = vpack.c.bf16 %v1425_v58, %v1420_v53  ;;  %v249_v63 = vpack.c.bf16 %v1428_v59, %v1423_v54  ;;  %324 = vmatprep.subr.bf16.mxu0 %v248_v60  ;;  %397 = vmatprep.subr.bf16.mxu1 %v250_v61 }
  0x90   :  { %325 = vmatpush1.bf16.msra.mxu0 %v247_v62  ;;  %398 = vmatpush1.bf16.msra.mxu1 %v249_v63 }
  0x93   :  { %1278 = vmatmul.mubr.msk.bf16.vlgmr.msra.gmra.mrb[0].mxu0 %vm311_vm0, %v1431_v0  ;;  %1282 = vmatmul.mubr.msk.bf16.vlgmr.msra.gmra.mrb[0].mxu1 %vm311_vm0, %v1431_v0 }
  0x94   :  { %366 = vmatprep.mubr.bf16.mxu0 %v1534_v28  ;;  %439 = vmatprep.mubr.bf16.mxu1 %v1534_v28 }
  0x9b   :  { %1279 = vmatmul.mubr.msk.bf16.gmra.mrb[4].mxu0 %vm311_vm0, %v1432_v1  ;;  %1283 = vmatmul.mubr.msk.bf16.gmra.mrb[4].mxu1 %vm311_vm0, %v1432_v1 }
  0x9c   :  { %376 = vmatprep.mubr.bf16.mxu0 %v1534_v28  ;;  %449 = vmatprep.mubr.bf16.mxu1 %v1534_v28 }
  0xa3   :  { %1280 = vmatmul.mubr.msk.bf16.gmra.mrb[8].mxu0 %vm311_vm0, %v1433_v2  ;;  %1284 = vmatmul.mubr.msk.bf16.gmra.mrb[8].mxu1 %vm311_vm0, %v1433_v2 }
  0xa4   :  { %386 = vmatprep.mubr.bf16.mxu0 %v1534_v28  ;;  %459 = vmatprep.mubr.bf16.mxu1 %v1534_v28 }
  0xab   :  { %1281 = vmatmul.mubr.msk.bf16.gmra.mrb[12].mxu0 %vm311_vm0, %v1434_v3  ;;  %1285 = vmatmul.mubr.msk.bf16.gmra.mrb[12].mxu1 %vm311_vm0, %v1434_v3 }
  0xac   :  { %779 = vmatprep.mubr.bf16.mxu0 %v1534_v28  ;;  %832 = vmatprep.mubr.bf16.mxu1 %v1534_v28 }
  0xe1   :  { %v259_v4 = vpop.permute.xlu1 %258 }
  0xe5   :  { %v264_v22 = vpop.permute.xlu1 %263 }
  0xe9   :  { %v269_v45 = vpop.permute.xlu1 %268 }
  0xea   :  { %v254_v5 = vpop.permute.xlu0 %253 }
 0x166   :  { %v358_v6 = vpop.f32.mrb[0].mxu0  ;;  %v431_v7 = vpop.f32.mrb[0].mxu1 }
 0x167   :  { %v1841_v8 = vadd.f32 %v358_v6, %v254_v5  ;;  %v1843_v9 = vadd.f32 %v431_v7, %v254_v5  ;;  %v360_v10 = vpop.f32.mrb[1].mxu0  ;;  %v433_v11 = vpop.f32.mrb[1].mxu1 }
 0x168   :  { %v362_v12 = vpop.f32.mrb[2].mxu0  ;;  %v435_v13 = vpop.f32.mrb[2].mxu1  ;;  %v1851_v23 = vadd.f32 %v360_v10, %v254_v5  ;;  %v1854_v25 = vadd.f32 %v433_v11, %v254_v5 }
 0x169   :  { %v502_v14 = vmin.f32 %v1841_v8, 0.0  ;;  %v504_v15 = vmin.f32 %v1843_v9, 0.0  ;;  %v364_v16 = vpop.f32.mrb[3].mxu0  ;;  %v437_v17 = vpop.f32.mrb[3].mxu1  ;;  %v1847_v20 = vadd.f32 %v362_v12, %v259_v4  ;;  %v1849_v21 = vadd.f32 %v435_v13, %v259_v4 }
 0x16a   :  { %v503_v37 = vmin.f32 %v1851_v23, 0.0  ;;  %v505_v41 = vmin.f32 %v1854_v25, 0.0  ;;  %v1863_v42 = vadd.f32 %v364_v16, %v259_v4  ;;  %v1872_v53 = vadd.f32 %v437_v17, %v259_v4 }
 0x16b   :  { %v534_v18 = vmul.f32 1.442695, %v502_v14  ;;  %v538_v19 = vmul.f32 1.442695, %v504_v15  ;;  %v506_v24 = vmin.f32 %v1847_v20, 0.0  ;;  %v508_v26 = vmin.f32 %v1849_v21, 0.0 }
 0x16c   :  { %v536_v47 = vmul.f32 1.442695, %v503_v37  ;;  %v540_v51 = vmul.f32 1.442695, %v505_v41  ;;  %v507_v52 = vmin.f32 %v1863_v42, 0.0  ;;  %vm470_vm1 = vcmp.ge.f32.partialorder %v1841_v8, 0.0 }
 0x16d   :  { %1438 = vpow2.f32 %v534_v18  ;;  %v542_v30 = vmul.f32 1.442695, %v506_v24  ;;  %v546_v33 = vmul.f32 1.442695, %v508_v26  ;;  %vm472_vm2 = vcmp.ge.f32.partialorder %v1843_v9, 0.0 }
 0x16e   :  { %1440 = vpow2.f32 %v538_v19  ;;  %v368_v27 = vpop.f32.mrb[4].mxu0  ;;  %v441_v29 = vpop.f32.mrb[4].mxu1  ;;  %vm474_vm3 = vcmp.ge.f32.partialorder %v1847_v20, 0.0  ;;  %v509_v10 = vmin.f32 %v1872_v53, 0.0  ;;  %v544_v13 = vmul.f32 1.442695, %v507_v52 }
 0x16f   :  { %v370_v31 = vpop.f32.mrb[5].mxu0  ;;  %v443_v32 = vpop.f32.mrb[5].mxu1  ;;  %v1857_v34 = vadd.f32 %v368_v27, %v264_v22  ;;  %1442 = vpow2.f32 %v542_v30  ;;  %v1860_v38 = vadd.f32 %v441_v29, %v264_v22  ;;  %vm476_vm4 = vcmp.ge.f32.partialorder %v1849_v21, 0.0 }
 0x170   :  { %v372_v35 = vpop.f32.mrb[6].mxu0  ;;  %v445_v36 = vpop.f32.mrb[6].mxu1  ;;  %1444 = vpow2.f32 %v546_v33  ;;  %v1874_v57 = vadd.f32 %v370_v31, %v264_v22  ;;  %v1876_v58 = vadd.f32 %v443_v32, %v264_v22  ;;  %v548_v30 = vmul.f32 1.442695, %v509_v10 }
 0x171   :  { %v374_v39 = vpop.f32.mrb[7].mxu0  ;;  %v447_v40 = vpop.f32.mrb[7].mxu1  ;;  %v510_v43 = vmin.f32 %v1857_v34, 0.0  ;;  %v512_v44 = vmin.f32 %v1860_v38, 0.0  ;;  %v1867_v49 = vadd.f32 %v372_v35, %v269_v45  ;;  %v1869_v50 = vadd.f32 %v445_v36, %v269_v45 }
 0x172   :  { %v1890_v5 = vadd.f32 %v374_v39, %v269_v45  ;;  %v511_v14 = vmin.f32 %v1874_v57, 0.0  ;;  %v513_v15 = vmin.f32 %v1876_v58, 0.0  ;;  %v274_v22 = vpop.permute.xlu1 %273  ;;  %v1902_v27 = vadd.f32 %v447_v40, %v269_v45 }
 0x173   :  { %v550_v46 = vmul.f32 1.442695, %v510_v43  ;;  %v554_v48 = vmul.f32 1.442695, %v512_v44  ;;  %v514_v59 = vmin.f32 %v1867_v49, 0.0  ;;  %v516_v0 = vmin.f32 %v1869_v50, 0.0 }
 0x174   :  { %v515_v26 = vmin.f32 %v1890_v5, 0.0  ;;  %v552_v36 = vmul.f32 1.442695, %v511_v14  ;;  %vm478_vm5 = vcmp.ge.f32.partialorder %v1857_v34, 0.0  ;;  %v517_v52 = vmin.f32 %v1902_v27, 0.0 }
 0x175   :  { %1446 = vpow2.f32 %v550_v46  ;;  %v558_v4 = vmul.f32 1.442695, %v514_v59  ;;  %v562_v11 = vmul.f32 1.442695, %v516_v0  ;;  %v556_v46 = vmul.f32 1.442695, %v513_v15 }
 0x176   :  { %v378_v54 = vpop.f32.mrb[8].mxu0  ;;  %v451_v55 = vpop.f32.mrb[8].mxu1  ;;  %1448 = vpow2.f32 %v554_v48  ;;  %vm480_vm6 = vcmp.ge.f32.partialorder %v1860_v38, 0.0  ;;  %vm482_vm7 = vcmp.ge.f32.partialorder %v1867_v49, 0.0  ;;  %vm484_vm8 = vcmp.ge.f32.partialorder %v1869_v50, 0.0 }
 0x177   :  { %v1439_v56 = vpop.eup %1438  ;;  %v1879_v60 = vpop.f32.mrb[9].mxu0  ;;  %1450 = vpow2.f32 %v536_v47  ;;  %v1904_v31 = vadd.f32 %v378_v54, %v274_v22  ;;  %v1910_v37 = vadd.f32 %v451_v55, %v274_v22  ;;  %vm471_vm9 = vcmp.ge.f32.partialorder %v1851_v23, 0.0 }
 0x178   :  { %v1881_v61 = vpop.f32.mrb[9].mxu1  ;;  %v1441_v62 = vpop.eup %1440  ;;  %v1286_v63 = vadd.f32 -1.0, %v1439_v56  ;;  %1452 = vpow2.f32 %v540_v51  ;;  %v1956_v10 = vadd.f32 %v1879_v60, %v274_v22  ;;  %vm475_vm11 = vcmp.ge.f32.partialorder %v1863_v42, 0.0 }
 0x179   :  { %v1886_v1 = vpop.f32.mrb[10].mxu0  ;;  %v1888_v2 = vpop.f32.mrb[10].mxu1  ;;  %v1288_v3 = vadd.f32 -1.0, %v1441_v62  ;;  %1454 = vpow2.f32 %v558_v4  ;;  %v518_v59 = vmin.f32 %v1904_v31, 0.0  ;;  %v520_v0 = vmin.f32 %v1910_v37, 0.0 }
 0x17a   :  { %v1892_v6 = vpop.f32.mrb[11].mxu0  ;;  %v1894_v7 = vpop.f32.mrb[11].mxu1  ;;  %v630_v17 = vmul.f32 0.15, %v1286_v63  ;;  %1456 = vpow2.f32 %v562_v11  ;;  %v1959_v14 = vadd.f32 %v1881_v61, %v274_v22  ;;  %vm486_vm10 = vcmp.ge.f32.partialorder %v1904_v31, 0.0 }
 0x17b   :  { %v1443_v12 = vpop.eup %1442  ;;  %v632_v18 = vmul.f32 0.15, %v1288_v3  ;;  %1458 = vpow2.f32 %v544_v13  ;;  %v566_v4 = vmul.f32 1.442695, %v518_v59  ;;  %v570_v13 = vmul.f32 1.442695, %v520_v0  ;;  %v284_v0 = vpop.permute.xlu1 %283 }
 0x17c   :  { %v1445_v16 = vpop.eup %1444  ;;  %v1290_v19 = vadd.f32 -1.0, %v1443_v12  ;;  %v1919_v40 = vsel %vm470_vm1, %v1841_v8, %v630_v17  ;;  %1460 = vpow2.f32 %v548_v30  ;;  %v564_v12 = vmul.f32 1.442695, %v517_v52 }
 0x17d   :  { %v1292_v24 = vadd.f32 -1.0, %v1445_v16  ;;  %v1924_v44 = vsel %vm472_vm2, %v1843_v9, %v632_v18  ;;  %v560_v9 = vmul.f32 1.442695, %v515_v26  ;;  %1462 = vpow2.f32 %v552_v36 }
 0x17e   :  { %v634_v29 = vmul.f32 0.15, %v1290_v19  ;;  %v1906_v32 = vpop.f32.mrb[12].mxu0  ;;  %v1908_v33 = vpop.f32.mrb[12].mxu1  ;;  %1464 = vpow2.f32 %v556_v46  ;;  %vm488_vm13 = vcmp.ge.f32.partialorder %v1910_v37, 0.0  ;;  %vm473_vm15 = vcmp.ge.f32.partialorder %v1854_v25, 0.0 }
 0x17f   :  { %v636_v35 = vmul.f32 0.15, %v1292_v24  ;;  %v1912_v39 = vpop.f32.mrb[13].mxu0  ;;  %v1914_v41 = vpop.f32.mrb[13].mxu1  ;;  %1466 = vpow2.f32 %v560_v9  ;;  %vm477_vm1 = vcmp.ge.f32.partialorder %v1872_v53, 0.0  ;;  %vm479_vm2 = vcmp.ge.f32.partialorder %v1874_v57, 0.0 }
 0x180   :  { %v1447_v43 = vpop.eup %1446  ;;  %v1929_v45 = vsel %vm474_vm3, %v1847_v20, %v634_v29  ;;  %v1931_v47 = vpop.f32.mrb[14].mxu0  ;;  %1468 = vpow2.f32 %v566_v4  ;;  %v519_v29 = vmin.f32 %v1956_v10, 0.0  ;;  %vm483_vm3 = vcmp.ge.f32.partialorder %v1890_v5, 0.0 }
 0x181   :  { %v1449_v48 = vpop.eup %1448  ;;  %v694_v51 = vpack.c.bf16 %v1929_v45, %v1919_v40  ;;  %v1938_v8 = vsel %vm476_vm4, %v1849_v21, %v636_v35  ;;  %v1942_v54 = vpop.f32.mrb[14].mxu1  ;;  %v1294_v56 = vadd.f32 -1.0, %v1447_v43  ;;  %1470 = vpow2.f32 %v570_v13 }
 0x182   :  { %v1944_v20 = vpop.f32.mrb[15].mxu0  ;;  %v696_v55 = vpack.c.bf16 %v1938_v8, %v1924_v44  ;;  %v1950_v21 = vpop.f32.mrb[15].mxu1  ;;  %v1296_v63 = vadd.f32 -1.0, %v1449_v48  ;;  %v521_v35 = vmin.f32 %v1959_v14, 0.0  ;;  %1472 = vpow2.f32 %v564_v12 }
 0x183   :  { %v1451_v62 = vpop.eup %1450  ;;  %v638_v17 = vmul.f32 0.15, %v1294_v56  ;;  %v279_v19 = vpop.permute.xlu0 %278  ;;  %v568_v43 = vmul.f32 1.442695, %v519_v29  ;;  %vm481_vm4 = vcmp.ge.f32.partialorder %v1876_v58, 0.0 }
 0x184   :  { %v1453_v3 = vpop.eup %1452  ;;  %v1287_v16 = vadd.f32 -1.0, %v1451_v62  ;;  %v640_v24 = vmul.f32 0.15, %v1296_v63  ;;  %v1964_v36 = vadd.f32 %v1886_v1, %v279_v19  ;;  %v1967_v46 = vadd.f32 %v1888_v2, %v279_v19 }
 0x185   :  { %v1455_v11 = vpop.eup %1454  ;;  %v1289_v60 = vadd.f32 -1.0, %v1453_v3  ;;  %v1972_v48 = vsel %vm478_vm5, %v1857_v34, %v638_v17  ;;  %v572_v52 = vmul.f32 1.442695, %v521_v35  ;;  %v1980_v1 = vadd.f32 %v1892_v6, %v279_v19 }
 0x186   :  { %v1457_v15 = vpop.eup %1456  ;;  %v1298_v18 = vadd.f32 -1.0, %v1455_v11  ;;  %v1985_v56 = vsel %vm480_vm6, %v1860_v38, %v640_v24  ;;  %v1995_v62 = vmul.f32 0.15, %v1287_v16  ;;  %1474 = vpow2.f32 %v568_v43 }
 0x187   :  { %v1300_v26 = vadd.f32 -1.0, %v1457_v15  ;;  %v1459_v61 = vpop.eup %1458  ;;  %v1999_v3 = vmul.f32 0.15, %v1289_v60  ;;  %1476 = vpow2.f32 %v572_v52  ;;  %v524_v11 = vmin.f32 %v1967_v46, 0.0 }
 0x188   :  { %v642_v30 = vmul.f32 0.15, %v1298_v18  ;;  %v1461_v59 = vpop.eup %1460  ;;  %v1291_v6 = vadd.f32 -1.0, %v1459_v61  ;;  %v523_v12 = vmin.f32 %v1980_v1, 0.0  ;;  %v2004_v13 = vadd.f32 %v1894_v7, %v279_v19 }
 0x189   :  { %v644_v22 = vmul.f32 0.15, %v1300_v26  ;;  %v1463_v38 = vpop.eup %1462  ;;  %v2007_v15 = vadd.f32 %v1906_v32, %v284_v0  ;;  %v2010_v16 = vadd.f32 %v1908_v33, %v284_v0  ;;  %v1293_v18 = vadd.f32 -1.0, %v1461_v59 }
 0x18a   :  { %v1977_v9 = vsel %vm482_vm7, %v1867_v49, %v642_v30  ;;  %v522_v49 = vmin.f32 %v1964_v36, 0.0  ;;  %v578_v24 = vmul.f32 1.442695, %v524_v11  ;;  %v2013_v26 = vadd.f32 %v1912_v39, %v284_v0 }
 0x18b   :  { %v698_v2 = vpack.c.bf16 %v1977_v9, %v1972_v48  ;;  %v1992_v34 = vsel %vm484_vm8, %v1869_v50, %v644_v22  ;;  %v1465_v50 = vpop.eup %1464  ;;  %v2015_v60 = vmul.f32 0.15, %v1291_v6  ;;  %v1295_v30 = vadd.f32 -1.0, %v1463_v38  ;;  %v289_v38 = vpop.permute.xlu0 %288 }
 0x18c   :  { %v700_v63 = vpack.c.bf16 %v1992_v34, %v1985_v56  ;;  %v574_v4 = vmul.f32 1.442695, %v522_v49  ;;  %v1467_v17 = vpop.eup %1466  ;;  %v576_v35 = vmul.f32 1.442695, %v523_v12  ;;  %v525_v7 = vmin.f32 %v2004_v13, 0.0 }
 0x18d   :  { %v1469_v29 = vpop.eup %1468  ;;  %v1297_v32 = vadd.f32 -1.0, %v1465_v50  ;;  %v526_v33 = vmin.f32 %v2007_v15, 0.0  ;;  %v1299_v22 = vadd.f32 -1.0, %v1467_v17  ;;  %v528_v39 = vmin.f32 %v2010_v16, 0.0 }
 0x18e   :  { %1478 = vpow2.f32 %v574_v4  ;;  %v1471_v19 = vpop.eup %1470  ;;  %v1302_v61 = vadd.f32 -1.0, %v1469_v29  ;;  %v580_v43 = vmul.f32 1.442695, %v525_v7  ;;  %v527_v6 = vmin.f32 %v2013_v26, 0.0 }
 0x18f   :  { %1480 = vpow2.f32 %v578_v24  ;;  %v1473_v52 = vpop.eup %1472  ;;  %v1304_v49 = vadd.f32 -1.0, %v1471_v19  ;;  %v582_v59 = vmul.f32 1.442695, %v526_v33  ;;  %v2024_v4 = vmul.f32 0.15, %v1293_v18 }
 0x190   :  { %1482 = vpow2.f32 %v576_v35  ;;  %v586_v11 = vmul.f32 1.442695, %v528_v39  ;;  %v2027_v50 = vadd.f32 %v1914_v41, %v284_v0  ;;  %v2029_v12 = vmul.f32 0.15, %v1295_v30  ;;  %v1475_v35 = vpop.eup %1474 }
 0x191   :  { %1484 = vpow2.f32 %v580_v43  ;;  %v646_v17 = vmul.f32 0.15, %v1302_v61  ;;  %v584_v24 = vmul.f32 1.442695, %v527_v6  ;;  %v2032_v29 = vadd.f32 %v1931_v47, %v289_v38  ;;  %v1477_v18 = vpop.eup %1476 }
 0x192   :  { %v2034_v7 = vmul.f32 0.15, %v1297_v32  ;;  %v2036_v19 = vmul.f32 0.15, %v1299_v22  ;;  %vm490_vm12 = vcmp.ge.f32.partialorder %v1964_v36, 0.0  ;;  %1486 = vpow2.f32 %v582_v59 }
 0x193   :  { %v1301_v33 = vadd.f32 -1.0, %v1473_v52  ;;  %v648_v41 = vmul.f32 0.15, %v1304_v49  ;;  %vm492_vm14 = vcmp.ge.f32.partialorder %v1967_v46, 0.0  ;;  %v529_v0 = vmin.f32 %v2027_v50, 0.0 }
 0x194   :  { %1488 = vpow2.f32 %v586_v11  ;;  %v530_v47 = vmin.f32 %v2032_v29, 0.0  ;;  %v2046_v30 = vadd.f32 %v1942_v54, %v289_v38  ;;  %v2049_v32 = vadd.f32 %v1944_v20, %v289_v38 }
 0x195   :  { %v2054_v22 = vsel %vm486_vm10, %v1904_v31, %v646_v17  ;;  %1490 = vpow2.f32 %v584_v24  ;;  %v588_v43 = vmul.f32 1.442695, %v529_v0  ;;  %v2057_v39 = vadd.f32 %v1950_v21, %v289_v38 }
 0x196   :  { %v1303_v54 = vadd.f32 -1.0, %v1475_v35  ;;  %v590_v49 = vmul.f32 1.442695, %v530_v47  ;;  %v532_v20 = vmin.f32 %v2046_v30, 0.0  ;;  %vm485_vm5 = vcmp.ge.f32.partialorder %v1902_v27, 0.0 }
 0x197   :  { %v1305_v31 = vadd.f32 -1.0, %v1477_v18  ;;  %1492 = vpow2.f32 %v588_v43  ;;  %v531_v6 = vmin.f32 %v2049_v32, 0.0  ;;  %v663_v21 = vsel %vm471_vm9, %v1851_v23, %v1995_v62 }
 0x198   :  { %v1479_v61 = vpop.eup %1478  ;;  %vm487_vm6 = vcmp.ge.f32.partialorder %v1956_v10, 0.0  ;;  %1494 = vpow2.f32 %v590_v49  ;;  %v594_v24 = vmul.f32 1.442695, %v532_v20  ;;  %vm489_vm7 = vcmp.ge.f32.partialorder %v1959_v14, 0.0 }
 0x199   :  { %v1306_v52 = vadd.f32 -1.0, %v1479_v61  ;;  %v1481_v59 = vpop.eup %1480  ;;  %v592_v0 = vmul.f32 1.442695, %v531_v6  ;;  %v533_v18 = vmin.f32 %v2057_v39, 0.0  ;;  %v667_v47 = vsel %vm475_vm11, %v1863_v42, %v2015_v60 }
 0x19a   :  { %v1483_v38 = vpop.eup %1482  ;;  %v1308_v17 = vadd.f32 -1.0, %v1481_v59  ;;  %1496 = vpow2.f32 %v594_v24  ;;  %v695_v43 = vpack.c.bf16 %v667_v47, %v663_v21  ;;  %v2086_v42 = vsel %vm488_vm13, %v1910_v37, %v648_v41 }
 0x19b   :  { %v650_v11 = vmul.f32 0.15, %v1306_v52  ;;  %v1307_v35 = vadd.f32 -1.0, %v1483_v38  ;;  %v1485_v61 = vpop.eup %1484  ;;  %v645_v52 = vmul.f32 0.15, %v1301_v33  ;;  %1498 = vpow2.f32 %v592_v0 }
 0x19c   :  { %v652_v62 = vmul.f32 0.15, %v1308_v17  ;;  %v1309_v20 = vadd.f32 -1.0, %v1485_v61  ;;  %v1487_v59 = vpop.eup %1486  ;;  %v647_v60 = vmul.f32 0.15, %v1303_v54  ;;  %747 = vmatprep.subr.bf16.mxu0 %v695_v43  ;;  %v665_v38 = vsel %vm473_vm15, %v1854_v25, %v1999_v3 }
 0x19d   :  { %v2079_v23 = vsel %vm490_vm12, %v1964_v36, %v650_v11  ;;  %v596_v6 = vmul.f32 1.442695, %v533_v18  ;;  %v651_v21 = vmul.f32 0.15, %v1307_v35  ;;  %v669_v37 = vsel %vm477_vm1, %v1872_v53, %v2024_v4  ;;  %748 = vmatpush1.bf16.msra.mxu0 %v694_v51 }
 0x19e   :  { %v702_v49 = vpack.c.bf16 %v2079_v23, %v2054_v22  ;;  %v2091_v36 = vsel %vm492_vm14, %v1967_v46, %v652_v62  ;;  %v1489_v46 = vpop.eup %1488  ;;  %v649_v41 = vmul.f32 0.15, %v1305_v31  ;;  %v653_v54 = vmul.f32 0.15, %v1309_v20  ;;  %v1435_v20 = vld [vmem:[%s2532_s3] sm:$0xff]  }
 0x19f   :  { %v704_v33 = vpack.c.bf16 %v2091_v36, %v2086_v42  ;;  %1500 = vpow2.f32 %v596_v6  ;;  %v697_v11 = vpack.c.bf16 %v669_v37, %v665_v38  ;;  %v1491_v17 = vpop.eup %1490  ;;  %vm491_vm8 = vcmp.ge.f32.partialorder %v1980_v1, 0.0 }
 0x1a0   :  { %v1310_v24 = vadd.f32 -1.0, %v1487_v59  ;;  %v671_v25 = vsel %vm479_vm2, %v1874_v57, %v2029_v12  ;;  %v675_v53 = vsel %vm483_vm3, %v1890_v5, %v2036_v19  ;;  %vm493_vm9 = vcmp.ge.f32.partialorder %v2004_v13, 0.0 }
 0x1a1   :  { %800 = vmatprep.subr.bf16.mxu1 %v697_v11  ;;  %v699_v40 = vpack.c.bf16 %v675_v53, %v671_v25  ;;  %v673_v45 = vsel %vm481_vm4, %v1876_v58, %v2034_v7  ;;  %v677_v51 = vsel %vm485_vm5, %v1902_v27, %v645_v52  ;;  %v1493_v3 = vpop.eup %1492  ;;  %v1312_v57 = vadd.f32 -1.0, %v1489_v46 }
 0x1a2   :  { %801 = vmatpush1.bf16.msra.mxu1 %v696_v55  ;;  %v701_v5 = vpack.c.bf16 %v677_v51, %v673_v45  ;;  %v679_v4 = vsel %vm487_vm6, %v1956_v10, %v647_v60  ;;  %v683_v12 = vsel %vm491_vm8, %v1980_v1, %v651_v21  ;;  %v1495_v19 = vpop.eup %1494  ;;  %v1311_v31 = vadd.f32 -1.0, %v1491_v17  ;;  %v718_v60 = vpop.permute.xlu0 %717 }
 0x1a3   :  { %749 = vmatprep.subr.bf16.mxu0 %v699_v40  ;;  %v703_v58 = vpack.c.bf16 %v683_v12, %v679_v4  ;;  %v681_v27 = vsel %vm489_vm7, %v1959_v14, %v649_v41  ;;  %v685_v44 = vsel %vm493_vm9, %v2004_v13, %v653_v54  ;;  %v654_v8 = vmul.f32 0.15, %v1310_v24 }
 0x1a4   :  { %v1314_v55 = vadd.f32 -1.0, %v1495_v19  ;;  %802 = vmatprep.subr.bf16.mxu1 %v701_v5  ;;  %750 = vmatpush1.bf16.msra.mxu0 %v698_v2  ;;  %v705_v10 = vpack.c.bf16 %v685_v44, %v681_v27  ;;  %v1497_v1 = vpop.eup %1496  ;;  %vm494_vm10 = vcmp.ge.f32.partialorder %v2007_v15, 0.0  ;;  %v656_v35 = vmul.f32 0.15, %v1312_v57 }
 0x1a5   :  { %751 = vmatprep.subr.bf16.mxu0 %v703_v58  ;;  %v1499_v7 = vpop.eup %1498  ;;  %v1313_v0 = vadd.f32 -1.0, %v1493_v3  ;;  %v1316_v18 = vadd.f32 -1.0, %v1497_v1  ;;  %vm496_vm11 = vcmp.ge.f32.partialorder %v2010_v16, 0.0  ;;  %v655_v13 = vmul.f32 0.15, %v1311_v31 }
 0x1a6   :  { %v658_v14 = vmul.f32 0.15, %v1314_v55  ;;  %803 = vmatpush1.bf16.msra.mxu1 %v700_v63  ;;  %vm498_vm12 = vcmp.ge.f32.partialorder %v2032_v29, 0.0  ;;  %v1315_v48 = vadd.f32 -1.0, %v1499_v7  ;;  %v686_v9 = vsel %vm494_vm10, %v2007_v15, %v654_v8  ;;  %v2195_v44 = vpop.permute.xlu0 %727 }
 0x1a7   :  { %804 = vmatprep.subr.bf16.mxu1 %v705_v10  ;;  %vm495_vm13 = vcmp.ge.f32.partialorder %v2013_v26, 0.0  ;;  %v660_v47 = vmul.f32 0.15, %v1316_v18  ;;  %vm500_vm14 = vcmp.ge.f32.partialorder %v2046_v30, 0.0  ;;  %vm499_vm15 = vcmp.ge.f32.partialorder %v2049_v32, 0.0 }
 0x1a8   :  { %v690_v2 = vsel %vm498_vm12, %v2032_v29, %v658_v14  ;;  %752 = vmatpush1.bf16.msra.mxu0 %v702_v49  ;;  %v659_v63 = vmul.f32 0.15, %v1315_v48  ;;  %v688_v61 = vsel %vm496_vm11, %v2010_v16, %v656_v35  ;;  %v657_v62 = vmul.f32 0.15, %v1313_v0 }
 0x1a9   :  { %v1501_v56 = vpop.eup %1500  ;;  %v706_v34 = vpack.c.bf16 %v690_v2, %v686_v9  ;;  %v692_v15 = vsel %vm500_vm14, %v2046_v30, %v660_v47  ;;  %v687_v22 = vsel %vm495_vm13, %v2013_v26, %v655_v13  ;;  %vm497_vm1 = vcmp.ge.f32.partialorder %v2027_v50, 0.0  ;;  %v1436_v26 = vld [vmem:[%s2532_s3 + $0x8] sm:$0xff]  }
 0x1aa   :  { %v1317_v43 = vadd.f32 -1.0, %v1501_v56  ;;  %805 = vmatpush1.bf16.msra.mxu1 %v704_v33  ;;  %v708_v29 = vpack.c.bf16 %v692_v15, %v688_v61  ;;  %v691_v23 = vsel %vm499_vm15, %v2049_v32, %v659_v63  ;;  %vm501_vm2 = vcmp.ge.f32.partialorder %v2057_v39, 0.0 }
 0x1ab   :  { %v707_v49 = vpack.c.bf16 %v691_v23, %v687_v22  ;;  %v689_v16 = vsel %vm497_vm1, %v2027_v50, %v657_v62  ;;  %vm740_vm3 = vcmask 523264   ;;  %v713_v50 = vpop.permute.xlu1 %712 }
 0x1ac   :  { %v661_v52 = vmul.f32 0.15, %v1317_v43 }
 0x1ad   :  { %753 = vmatprep.subr.bf16.mxu0 %v707_v49 }
 0x1ae   :  { %v693_v30 = vsel %vm501_vm2, %v2057_v39, %v661_v52  ;;  %754 = vmatpush1.bf16.msra.mxu0 %v706_v34 }
 0x1af   :  { %v709_v59 = vpack.c.bf16 %v693_v30, %v689_v16  ;;  %v723_v19 = vpop.permute.xlu1 %722 }
 0x1b1   :  { %806 = vmatprep.subr.bf16.mxu1 %v709_v59  ;;  %1320 = vmatmul.mubr.msk.bf16.vlgmr.msra.gmra.mrb[16].mxu0 %vm740_vm3, %v1435_v20 }
 0x1b2   :  { %807 = vmatpush1.bf16.msra.mxu1 %v708_v29  ;;  %789 = vmatprep.mubr.bf16.mxu0 %v1534_v28 }
 0x1b5   :  { %1322 = vmatmul.mubr.msk.bf16.vlgmr.msra.gmra.mrb[16].mxu1 %vm740_vm3, %v1435_v20 }
 0x1b6   :  { %842 = vmatprep.mubr.bf16.mxu1 %v1534_v28 }
 0x1b9   :  { %1321 = vmatmul.mubr.msk.bf16.gmra.mrb[20].mxu0 %vm740_vm3, %v1436_v26 }
 0x1ba   :  { %1024 = vmatprep.mubr.bf16.mxu0 %v1534_v28 }
 0x1bd   :  { %1323 = vmatmul.mubr.msk.bf16.gmra.mrb[20].mxu1 %vm740_vm3, %v1436_v26 }
 0x1be   :  { %1067 = vmatprep.mubr.bf16.mxu1 %v1534_v28 }
 0x284   :  { %v781_v32 = vpop.f32.mrb[16].mxu0 }
 0x285   :  { %v2174_v39 = vadd.f32 %v781_v32, %v713_v50  ;;  %v783_v42 = vpop.f32.mrb[17].mxu0 }
 0x286   :  { %v2176_v36 = vadd.f32 %v783_v42, %v713_v50  ;;  %v785_v6 = vpop.f32.mrb[18].mxu0 }
 0x287   :  { %v869_v33 = vmin.f32 %v2174_v39, 0.0  ;;  %v2179_v38 = vadd.f32 %v785_v6, %v718_v60  ;;  %v787_v37 = vpop.f32.mrb[19].mxu0  ;;  %vm853_vm4 = vcmp.ge.f32.partialorder %v2174_v39, 0.0 }
 0x288   :  { %v834_v21 = vpop.f32.mrb[16].mxu1  ;;  %v870_v41 = vmin.f32 %v2176_v36, 0.0  ;;  %v2187_v25 = vadd.f32 %v787_v37, %v718_v60  ;;  %vm854_vm5 = vcmp.ge.f32.partialorder %v2176_v36, 0.0 }
 0x289   :  { %v2181_v46 = vadd.f32 %v834_v21, %v713_v50  ;;  %v836_v28 = vpop.f32.mrb[17].mxu1  ;;  %v885_v54 = vmul.f32 1.442695, %v869_v33  ;;  %v873_v17 = vmin.f32 %v2179_v38, 0.0  ;;  %vm857_vm6 = vcmp.ge.f32.partialorder %v2179_v38, 0.0 }
 0x28a   :  { %v2184_v11 = vadd.f32 %v836_v28, %v713_v50  ;;  %v838_v24 = vpop.f32.mrb[18].mxu1  ;;  %v887_v40 = vmul.f32 1.442695, %v870_v41  ;;  %v874_v58 = vmin.f32 %v2187_v25, 0.0  ;;  %vm858_vm9 = vcmp.ge.f32.partialorder %v2187_v25, 0.0 }
 0x28b   :  { %v871_v53 = vmin.f32 %v2181_v46, 0.0  ;;  %v2190_v45 = vadd.f32 %v838_v24, %v718_v60  ;;  %v840_v51 = vpop.f32.mrb[19].mxu1  ;;  %1502 = vpow2.f32 %v885_v54  ;;  %v893_v57 = vmul.f32 1.442695, %v873_v17 }
 0x28c   :  { %v872_v3 = vmin.f32 %v2184_v11, 0.0  ;;  %1504 = vpow2.f32 %v887_v40  ;;  %v791_v12 = vpop.f32.mrb[20].mxu0  ;;  %v2197_v55 = vadd.f32 %v840_v51, %v718_v60  ;;  %v895_v7 = vmul.f32 1.442695, %v874_v58 }
 0x28d   :  { %v889_v5 = vmul.f32 1.442695, %v871_v53  ;;  %v875_v4 = vmin.f32 %v2190_v45, 0.0  ;;  %1506 = vpow2.f32 %v893_v57  ;;  %v793_v27 = vpop.f32.mrb[21].mxu0  ;;  %v2199_v10 = vadd.f32 %v791_v12, %v723_v19 }
 0x28e   :  { %v891_v31 = vmul.f32 1.442695, %v872_v3  ;;  %v795_v1 = vpop.f32.mrb[22].mxu0  ;;  %v2201_v0 = vadd.f32 %v793_v27, %v723_v19  ;;  %v876_v13 = vmin.f32 %v2197_v55, 0.0  ;;  %vm855_vm7 = vcmp.ge.f32.partialorder %v2181_v46, 0.0 }
 0x28f   :  { %1508 = vpow2.f32 %v889_v5  ;;  %v897_v8 = vmul.f32 1.442695, %v875_v4  ;;  %v2204_v14 = vadd.f32 %v795_v1, %v2195_v44  ;;  %v797_v18 = vpop.f32.mrb[23].mxu0  ;;  %v877_v9 = vmin.f32 %v2199_v10, 0.0 }
 0x290   :  { %1510 = vpow2.f32 %v891_v31  ;;  %v844_v35 = vpop.f32.mrb[20].mxu1  ;;  %v899_v56 = vmul.f32 1.442695, %v876_v13  ;;  %v878_v34 = vmin.f32 %v2201_v0, 0.0  ;;  %v2221_v26 = vadd.f32 %v797_v18, %v2195_v44 }
 0x291   :  { %1512 = vpow2.f32 %v897_v8  ;;  %v846_v48 = vpop.f32.mrb[21].mxu1  ;;  %v2208_v2 = vadd.f32 %v844_v35, %v723_v19  ;;  %v901_v62 = vmul.f32 1.442695, %v877_v9  ;;  %v881_v43 = vmin.f32 %v2204_v14, 0.0 }
 0x292   :  { %1514 = vpow2.f32 %v895_v7  ;;  %v848_v47 = vpop.f32.mrb[22].mxu1  ;;  %v2211_v63 = vadd.f32 %v846_v48, %v723_v19  ;;  %v903_v29 = vmul.f32 1.442695, %v878_v34  ;;  %v882_v53 = vmin.f32 %v2221_v26, 0.0 }
 0x293   :  { %v850_v61 = vpop.f32.mrb[23].mxu1  ;;  %v879_v15 = vmin.f32 %v2208_v2, 0.0  ;;  %1516 = vpow2.f32 %v899_v56  ;;  %v909_v49 = vmul.f32 1.442695, %v881_v43  ;;  %v2218_v16 = vadd.f32 %v848_v47, %v2195_v44 }
 0x294   :  { %v880_v22 = vmin.f32 %v2211_v63, 0.0  ;;  %1518 = vpow2.f32 %v901_v62  ;;  %v2229_v57 = vadd.f32 %v850_v61, %v2195_v44  ;;  %v911_v19 = vmul.f32 1.442695, %v882_v53 }
 0x295   :  { %v1503_v23 = vpop.eup %1502  ;;  %v905_v52 = vmul.f32 1.442695, %v879_v15  ;;  %1520 = vpow2.f32 %v903_v29  ;;  %v883_v42 = vmin.f32 %v2218_v16, 0.0  ;;  %vm859_vm8 = vcmp.ge.f32.partialorder %v2190_v45, 0.0 }
 0x296   :  { %v1505_v30 = vpop.eup %1504  ;;  %v1324_v20 = vadd.f32 -1.0, %v1503_v23  ;;  %v907_v59 = vmul.f32 1.442695, %v880_v22  ;;  %v884_v1 = vmin.f32 %v2229_v57, 0.0  ;;  %vm856_vm10 = vcmp.ge.f32.partialorder %v2184_v11, 0.0 }
 0x297   :  { %v1507_v50 = vpop.eup %1506  ;;  %v1325_v32 = vadd.f32 -1.0, %v1505_v30  ;;  %1522 = vpow2.f32 %v905_v52  ;;  %v913_v41 = vmul.f32 1.442695, %v883_v42  ;;  %vm860_vm11 = vcmp.ge.f32.partialorder %v2197_v55, 0.0 }
 0x298   :  { %v933_v6 = vmul.f32 0.1, %v1324_v20  ;;  %v1328_v33 = vadd.f32 -1.0, %v1507_v50  ;;  %1524 = vpow2.f32 %v907_v59  ;;  %v915_v47 = vmul.f32 1.442695, %v884_v1 }
 0x299   :  { %v1509_v60 = vpop.eup %1508  ;;  %1526 = vpow2.f32 %v909_v49  ;;  %v934_v54 = vmul.f32 0.1, %v1325_v32  ;;  %vm861_vm12 = vcmp.ge.f32.partialorder %v2199_v10, 0.0  ;;  %vm863_vm13 = vcmp.ge.f32.partialorder %v2208_v2, 0.0 }
 0x29a   :  { %v1511_v21 = vpop.eup %1510  ;;  %v1326_v37 = vadd.f32 -1.0, %v1509_v60  ;;  %v937_v24 = vmul.f32 0.1, %v1328_v33  ;;  %1528 = vpow2.f32 %v913_v41  ;;  %v949_v5 = vsel %vm853_vm4, %v2174_v39, %v933_v6 }
 0x29b   :  { %v1513_v28 = vpop.eup %1512  ;;  %v1327_v17 = vadd.f32 -1.0, %v1511_v21  ;;  %1530 = vpow2.f32 %v911_v19  ;;  %v950_v18 = vsel %vm854_vm5, %v2176_v36, %v934_v54  ;;  %vm865_vm14 = vcmp.ge.f32.partialorder %v2204_v14, 0.0 }
 0x29c   :  { %v1515_v40 = vpop.eup %1514  ;;  %v935_v51 = vmul.f32 0.1, %v1326_v37  ;;  %v1330_v3 = vadd.f32 -1.0, %v1513_v28  ;;  %v953_v4 = vsel %vm857_vm6, %v2179_v38, %v937_v24  ;;  %1532 = vpow2.f32 %v915_v47 }
 0x29d   :  { %v1329_v12 = vadd.f32 -1.0, %v1515_v40  ;;  %v965_v31 = vpack.c.bf16 %v953_v4, %v949_v5  ;;  %v1517_v27 = vpop.eup %1516  ;;  %v936_v8 = vmul.f32 0.1, %v1327_v17  ;;  %vm867_vm15 = vcmp.ge.f32.partialorder %v2218_v16, 0.0 }
 0x29e   :  { %v939_v58 = vmul.f32 0.1, %v1330_v3  ;;  %v1519_v7 = vpop.eup %1518  ;;  %v951_v39 = vsel %vm855_vm7, %v2181_v46, %v935_v51  ;;  %v1331_v35 = vadd.f32 -1.0, %v1517_v27  ;;  %vm862_vm1 = vcmp.ge.f32.partialorder %v2201_v0, 0.0 }
 0x29f   :  { %v938_v44 = vmul.f32 0.1, %v1329_v12  ;;  %v1521_v13 = vpop.eup %1520  ;;  %v1332_v9 = vadd.f32 -1.0, %v1519_v7  ;;  %v952_v36 = vsel %vm856_vm10, %v2184_v11, %v936_v8  ;;  %vm866_vm2 = vcmp.ge.f32.partialorder %v2221_v26, 0.0 }
 0x2a0   :  { %v955_v38 = vsel %vm859_vm8, %v2190_v45, %v939_v58  ;;  %v940_v61 = vmul.f32 0.1, %v1331_v35  ;;  %v1333_v52 = vadd.f32 -1.0, %v1521_v13  ;;  %vm864_vm3 = vcmp.ge.f32.partialorder %v2211_v63, 0.0 }
 0x2a1   :  { %v967_v48 = vpack.c.bf16 %v955_v38, %v951_v39  ;;  %v954_v56 = vsel %vm858_vm9, %v2187_v25, %v938_v44  ;;  %v1523_v34 = vpop.eup %1522  ;;  %v941_v29 = vmul.f32 0.1, %v1332_v9  ;;  %vm868_vm4 = vcmp.ge.f32.partialorder %v2229_v57, 0.0 }
 0x2a2   :  { %v966_v62 = vpack.c.bf16 %v954_v56, %v950_v18  ;;  %v1525_v15 = vpop.eup %1524  ;;  %v1334_v46 = vadd.f32 -1.0, %v1523_v34  ;;  %v956_v43 = vsel %vm860_vm11, %v2197_v55, %v940_v61  ;;  %v942_v32 = vmul.f32 0.1, %v1333_v52 }
 0x2a3   :  { %v1527_v45 = vpop.eup %1526  ;;  %v968_v23 = vpack.c.bf16 %v956_v43, %v952_v36  ;;  %v957_v55 = vsel %vm861_vm12, %v2199_v10, %v941_v29  ;;  %v1335_v42 = vadd.f32 -1.0, %v1525_v15  ;;  %vm988_vm5 = vcmask 261120  }
 0x2a4   :  { %992 = vmatprep.subr.bf16.mxu0 %v966_v62  ;;  %v1336_v22 = vadd.f32 -1.0, %v1527_v45  ;;  %v1529_v25 = vpop.eup %1528  ;;  %v943_v49 = vmul.f32 0.1, %v1334_v46  ;;  %v958_v54 = vsel %vm862_vm1, %v2201_v0, %v942_v32 }
 0x2a5   :  { %993 = vmatpush1.bf16.msra.mxu0 %v965_v31  ;;  %v1338_v20 = vadd.f32 -1.0, %v1529_v25  ;;  %1035 = vmatprep.subr.bf16.mxu1 %v968_v23  ;;  %v1531_v11 = vpop.eup %1530  ;;  %v944_v10 = vmul.f32 0.1, %v1335_v42  ;;  %v981_v31 = vpop.permute.xlu0 %980 }
 0x2a6   :  { %v945_v30 = vmul.f32 0.1, %v1336_v22  ;;  %1036 = vmatpush1.bf16.msra.mxu1 %v967_v48  ;;  %v1337_v6 = vadd.f32 -1.0, %v1531_v11  ;;  %v959_v33 = vsel %vm863_vm13, %v2208_v2, %v943_v49  ;;  %v1533_v28 = vpop.eup %1532  ;;  %v1437_v2 = vld [vmem:[%s2533_s5] sm:$0xff]  }
 0x2a7   :  { %v947_v50 = vmul.f32 0.1, %v1338_v20 }
 0x2a8   :  { %v961_v59 = vsel %vm865_vm14, %v2204_v14, %v945_v30  ;;  %v946_v41 = vmul.f32 0.1, %v1337_v6  ;;  %v1339_v14 = vadd.f32 -1.0, %v1533_v28 }
 0x2a9   :  { %v969_v60 = vpack.c.bf16 %v961_v59, %v957_v55  ;;  %v963_v21 = vsel %vm867_vm15, %v2218_v16, %v947_v50  ;;  %v960_v16 = vsel %vm864_vm3, %v2211_v63, %v944_v10 }
 0x2aa   :  { %v971_v37 = vpack.c.bf16 %v963_v21, %v959_v33  ;;  %v962_v17 = vsel %vm866_vm2, %v2221_v26, %v946_v41  ;;  %v948_v53 = vmul.f32 0.1, %v1339_v14  ;;  %v976_v26 = vpop.permute.xlu1 %975 }
 0x2ab   :  { %v970_v24 = vpack.c.bf16 %v962_v17, %v958_v54 }
 0x2ac   :  { %v964_v40 = vsel %vm868_vm4, %v2229_v57, %v948_v53 }
 0x2ad   :  { %994 = vmatprep.subr.bf16.mxu0 %v970_v24  ;;  %v972_v0 = vpack.c.bf16 %v964_v40, %v960_v16 }
 0x2ae   :  { %995 = vmatpush1.bf16.msra.mxu0 %v969_v60 }
 0x2af   :  { %1037 = vmatprep.subr.bf16.mxu1 %v972_v0 }
 0x2b0   :  { %1038 = vmatpush1.bf16.msra.mxu1 %v971_v37 }
 0x2b1   :  { %1341 = vmatmul.mubr.msk.bf16.vlgmr.msra.gmra.mrb[24].mxu0 %vm988_vm5, %v1437_v2 }
 0x2b3   :  { %1342 = vmatmul.mubr.msk.bf16.vlgmr.msra.gmra.mrb[24].mxu1 %vm988_vm5, %v1437_v2 }
 0x384   :  { %v1026_v51 = vpop.f32.mrb[24].mxu0 }
 0x385   :  { %v1027_v3 = vadd.f32 %v1026_v51, %v976_v26  ;;  %v1028_v5 = vpop.f32.mrb[25].mxu0 }
 0x386   :  { %v1029_v4 = vadd.f32 %v1028_v5, %v976_v26  ;;  %v1030_v12 = vpop.f32.mrb[26].mxu0  ;;  %v1069_v58 = vpop.f32.mrb[24].mxu1 }
 0x387   :  { %v1032_v19 = vpop.f32.mrb[27].mxu0  ;;  %1078 = vxpose.xlu1.b32.start [1/2] (short) %v1027_v3, 128  ;;  %v1071_v63 = vpop.f32.mrb[25].mxu1  ;;  %v1031_v57 = vadd.f32 %v1030_v12, %v981_v31  ;;  %v1070_v7 = vadd.f32 %v1069_v58, %v976_v26 }
 0x388   :  { %1110 = vxpose.xlu0.b32.start [1/2] (short) %v1029_v4, 128  ;;  %v1073_v27 = vpop.f32.mrb[26].mxu1  ;;  %v1033_v8 = vadd.f32 %v1032_v19, %v981_v31  ;;  %v1072_v1 = vadd.f32 %v1071_v63, %v976_v26 }
 0x389   :  { %v1075_v44 = vpop.f32.mrb[27].mxu1  ;;  %v1074_v38 = vadd.f32 %v1073_v27, %v981_v31 }
 0x38a   :  { %v1076_v39 = vadd.f32 %v1075_v44, %v981_v31 }
 0x38b   :  { %1079 = vxpose.xlu1.b32.end [2/2] (short) %v1031_v57, 128 }
 0x38c   :  { %1111 = vxpose.xlu0.b32.end [2/2] (short) %v1033_v8, 128 }
 0x3c4   :  { %1174 = vxpose.xlu1.b32.start [1/2] (short) %v1072_v1, 128 }
 0x3c5   :  { %1142 = vxpose.xlu0.b32.start [1/2] (short) %v1070_v7, 128 }
 0x3c8   :  { %1175 = vxpose.xlu1.b32.end [2/2] (short) %v1076_v39, 128 }
 0x3c9   :  { %1143 = vxpose.xlu0.b32.end [2/2] (short) %v1074_v38, 128 }
 0x407   :  { %v1094_v35 = vpop.trf.xlu1 }
 0x408   :  { %v1126_v18 = vpop.trf.xlu0  ;;  %1206 = vst.msk [vmem:[%s2534_s7] sm:$0xff] %vm311_vm0, %v1094_v35 }
 0x409   :  { %1222 = vst.msk [vmem:[%s2534_s7 + $0x80] sm:$0xff] %vm311_vm0, %v1126_v18 }
 0x40b   :  { %v1095_v13 = vpop.trf.xlu1 }
 0x40c   :  { %v1127_v48 = vpop.trf.xlu0  ;;  %1207 = vst.msk [vmem:[%s2534_s7 + $0x8] sm:$0xff] %vm311_vm0, %v1095_v13 }
 0x40d   :  { %1223 = vst.msk [vmem:[%s2534_s7 + $0x88] sm:$0xff] %vm311_vm0, %v1127_v48 }
 0x40f   :  { %v1096_v9 = vpop.trf.xlu1 }
 0x410   :  { %v1128_v47 = vpop.trf.xlu0  ;;  %1208 = vst.msk [vmem:[%s2534_s7 + $0x10] sm:$0xff] %vm311_vm0, %v1096_v9 }
 0x411   :  { %1224 = vst.msk [vmem:[%s2534_s7 + $0x90] sm:$0xff] %vm311_vm0, %v1128_v47 }
 0x413   :  { %v1097_v56 = vpop.trf.xlu1 }
 0x414   :  { %v1129_v34 = vpop.trf.xlu0  ;;  %1209 = vst.msk [vmem:[%s2534_s7 + $0x18] sm:$0xff] %vm311_vm0, %v1097_v56 }
 0x415   :  { %1225 = vst.msk [vmem:[%s2534_s7 + $0x98] sm:$0xff] %vm311_vm0, %v1129_v34 }
 0x417   :  { %v1098_v61 = vpop.trf.xlu1 }
 0x418   :  { %v1130_v62 = vpop.trf.xlu0  ;;  %1210 = vst.msk [vmem:[%s2534_s7 + $0x20] sm:$0xff] %vm311_vm0, %v1098_v61 }
 0x419   :  { %1226 = vst.msk [vmem:[%s2534_s7 + $0xa0] sm:$0xff] %vm311_vm0, %v1130_v62 }
 0x41b   :  { %v1099_v15 = vpop.trf.xlu1 }
 0x41c   :  { %v1131_v46 = vpop.trf.xlu0  ;;  %1211 = vst.msk [vmem:[%s2534_s7 + $0x28] sm:$0xff] %vm311_vm0, %v1099_v15 }
 0x41d   :  { %1227 = vst.msk [vmem:[%s2534_s7 + $0xa8] sm:$0xff] %vm311_vm0, %v1131_v46 }
 0x41f   :  { %v1100_v45 = vpop.trf.xlu1 }
 0x420   :  { %v1132_v36 = vpop.trf.xlu0  ;;  %1212 = vst.msk [vmem:[%s2534_s7 + $0x30] sm:$0xff] %vm311_vm0, %v1100_v45 }
 0x421   :  { %1228 = vst.msk [vmem:[%s2534_s7 + $0xb0] sm:$0xff] %vm311_vm0, %v1132_v36 }
 0x423   :  { %v1101_v43 = vpop.trf.xlu1 }
 0x424   :  { %v1133_v29 = vpop.trf.xlu0  ;;  %1213 = vst.msk [vmem:[%s2534_s7 + $0x38] sm:$0xff] %vm311_vm0, %v1101_v43 }
 0x425   :  { %1229 = vst.msk [vmem:[%s2534_s7 + $0xb8] sm:$0xff] %vm311_vm0, %v1133_v29 }
 0x427   :  { %v1102_v22 = vpop.trf.xlu1 }
 0x428   :  { %v1134_v23 = vpop.trf.xlu0  ;;  %1214 = vst.msk [vmem:[%s2534_s7 + $0x40] sm:$0xff] %vm311_vm0, %v1102_v22 }
 0x429   :  { %1230 = vst.msk [vmem:[%s2534_s7 + $0xc0] sm:$0xff] %vm311_vm0, %v1134_v23 }
 0x42b   :  { %v1103_v25 = vpop.trf.xlu1 }
 0x42c   :  { %v1135_v52 = vpop.trf.xlu0  ;;  %1215 = vst.msk [vmem:[%s2534_s7 + $0x48] sm:$0xff] %vm311_vm0, %v1103_v25 }
 0x42d   :  { %1231 = vst.msk [vmem:[%s2534_s7 + $0xc8] sm:$0xff] %vm311_vm0, %v1135_v52 }
 0x42f   :  { %v1104_v49 = vpop.trf.xlu1 }
 0x430   :  { %v1136_v30 = vpop.trf.xlu0  ;;  %1216 = vst.msk [vmem:[%s2534_s7 + $0x50] sm:$0xff] %vm311_vm0, %v1104_v49 }
 0x431   :  { %1232 = vst.msk [vmem:[%s2534_s7 + $0xd0] sm:$0xff] %vm311_vm0, %v1136_v30 }
 0x433   :  { %v1105_v20 = vpop.trf.xlu1 }
 0x434   :  { %v1137_v11 = vpop.trf.xlu0  ;;  %1217 = vst.msk [vmem:[%s2534_s7 + $0x58] sm:$0xff] %vm311_vm0, %v1105_v20 }
 0x435   :  { %1233 = vst.msk [vmem:[%s2534_s7 + $0xd8] sm:$0xff] %vm311_vm0, %v1137_v11 }
 0x437   :  { %v1106_v55 = vpop.trf.xlu1 }
 0x438   :  { %v1138_v59 = vpop.trf.xlu0  ;;  %1218 = vst.msk [vmem:[%s2534_s7 + $0x60] sm:$0xff] %vm311_vm0, %v1106_v55 }
 0x439   :  { %1234 = vst.msk [vmem:[%s2534_s7 + $0xe0] sm:$0xff] %vm311_vm0, %v1138_v59 }
 0x43b   :  { %v1107_v50 = vpop.trf.xlu1 }
 0x43c   :  { %v1139_v32 = vpop.trf.xlu0  ;;  %1219 = vst.msk [vmem:[%s2534_s7 + $0x68] sm:$0xff] %vm311_vm0, %v1107_v50 }
 0x43d   :  { %1235 = vst.msk [vmem:[%s2534_s7 + $0xe8] sm:$0xff] %vm311_vm0, %v1139_v32 }
 0x43f   :  { %v1108_v42 = vpop.trf.xlu1 }
 0x440   :  { %v1140_v60 = vpop.trf.xlu0  ;;  %1220 = vst.msk [vmem:[%s2534_s7 + $0x70] sm:$0xff] %vm311_vm0, %v1108_v42 }
 0x441   :  { %1236 = vst.msk [vmem:[%s2534_s7 + $0xf0] sm:$0xff] %vm311_vm0, %v1140_v60 }
 0x443   :  { %v1109_v6 = vpop.trf.xlu1 }
 0x444   :  { %v1141_v33 = vpop.trf.xlu0  ;;  %1221 = vst.msk [vmem:[%s2534_s7 + $0x78] sm:$0xff] %vm311_vm0, %v1109_v6 }
 0x445   :  { %1237 = vst.msk [vmem:[%s2534_s7 + $0xf8] sm:$0xff] %vm311_vm0, %v1141_v33 }
 0x447   :  { %v1190_v21 = vpop.trf.xlu1 }
 0x448   :  { %v1158_v37 = vpop.trf.xlu0  ;;  %1254 = vst.msk [vmem:[%s2534_s7 + $0x180] sm:$0xff] %vm311_vm0, %v1190_v21 }
 0x449   :  { %1238 = vst.msk [vmem:[%s2534_s7 + $0x100] sm:$0xff] %vm311_vm0, %v1158_v37 }
 0x44b   :  { %v1191_v41 = vpop.trf.xlu1 }
 0x44c   :  { %v1159_v28 = vpop.trf.xlu0  ;;  %1255 = vst.msk [vmem:[%s2534_s7 + $0x188] sm:$0xff] %vm311_vm0, %v1191_v41 }
 0x44d   :  { %1239 = vst.msk [vmem:[%s2534_s7 + $0x108] sm:$0xff] %vm311_vm0, %v1159_v28 }
 0x44f   :  { %v1192_v10 = vpop.trf.xlu1 }
 0x450   :  { %v1160_v14 = vpop.trf.xlu0  ;;  %1256 = vst.msk [vmem:[%s2534_s7 + $0x190] sm:$0xff] %vm311_vm0, %v1192_v10 }
 0x451   :  { %1240 = vst.msk [vmem:[%s2534_s7 + $0x110] sm:$0xff] %vm311_vm0, %v1160_v14 }
 0x453   :  { %v1193_v54 = vpop.trf.xlu1 }
 0x454   :  { %v1161_v17 = vpop.trf.xlu0  ;;  %1257 = vst.msk [vmem:[%s2534_s7 + $0x198] sm:$0xff] %vm311_vm0, %v1193_v54 }
 0x455   :  { %1241 = vst.msk [vmem:[%s2534_s7 + $0x118] sm:$0xff] %vm311_vm0, %v1161_v17 }
 0x457   :  { %v1194_v24 = vpop.trf.xlu1 }
 0x458   :  { %v1162_v53 = vpop.trf.xlu0  ;;  %1258 = vst.msk [vmem:[%s2534_s7 + $0x1a0] sm:$0xff] %vm311_vm0, %v1194_v24 }
 0x459   :  { %1242 = vst.msk [vmem:[%s2534_s7 + $0x120] sm:$0xff] %vm311_vm0, %v1162_v53 }
 0x45b   :  { %v1195_v2 = vpop.trf.xlu1 }
 0x45c   :  { %v1163_v16 = vpop.trf.xlu0  ;;  %1259 = vst.msk [vmem:[%s2534_s7 + $0x1a8] sm:$0xff] %vm311_vm0, %v1195_v2 }
 0x45d   :  { %1243 = vst.msk [vmem:[%s2534_s7 + $0x128] sm:$0xff] %vm311_vm0, %v1163_v16 }
 0x45f   :  { %v1196_v40 = vpop.trf.xlu1 }
 0x460   :  { %v1164_v0 = vpop.trf.xlu0  ;;  %1260 = vst.msk [vmem:[%s2534_s7 + $0x1b0] sm:$0xff] %vm311_vm0, %v1196_v40 }
 0x461   :  { %1244 = vst.msk [vmem:[%s2534_s7 + $0x130] sm:$0xff] %vm311_vm0, %v1164_v0 }
 0x463   :  { %v1197_v26 = vpop.trf.xlu1 }
 0x464   :  { %v1165_v51 = vpop.trf.xlu0  ;;  %1261 = vst.msk [vmem:[%s2534_s7 + $0x1b8] sm:$0xff] %vm311_vm0, %v1197_v26 }
 0x465   :  { %1245 = vst.msk [vmem:[%s2534_s7 + $0x138] sm:$0xff] %vm311_vm0, %v1165_v51 }
 0x467   :  { %v1198_v3 = vpop.trf.xlu1 }
 0x468   :  { %v1166_v5 = vpop.trf.xlu0  ;;  %1262 = vst.msk [vmem:[%s2534_s7 + $0x1c0] sm:$0xff] %vm311_vm0, %v1198_v3 }
 0x469   :  { %1246 = vst.msk [vmem:[%s2534_s7 + $0x140] sm:$0xff] %vm311_vm0, %v1166_v5 }
 0x46b   :  { %v1199_v4 = vpop.trf.xlu1 }
 0x46c   :  { %v1167_v12 = vpop.trf.xlu0  ;;  %1263 = vst.msk [vmem:[%s2534_s7 + $0x1c8] sm:$0xff] %vm311_vm0, %v1199_v4 }
 0x46d   :  { %1247 = vst.msk [vmem:[%s2534_s7 + $0x148] sm:$0xff] %vm311_vm0, %v1167_v12 }
 0x46f   :  { %v1200_v19 = vpop.trf.xlu1 }
 0x470   :  { %v1168_v31 = vpop.trf.xlu0  ;;  %1264 = vst.msk [vmem:[%s2534_s7 + $0x1d0] sm:$0xff] %vm311_vm0, %v1200_v19 }
 0x471   :  { %1248 = vst.msk [vmem:[%s2534_s7 + $0x150] sm:$0xff] %vm311_vm0, %v1168_v31 }
 0x473   :  { %v1201_v58 = vpop.trf.xlu1 }
 0x474   :  { %v1169_v63 = vpop.trf.xlu0  ;;  %1265 = vst.msk [vmem:[%s2534_s7 + $0x1d8] sm:$0xff] %vm311_vm0, %v1201_v58 }
 0x475   :  { %1249 = vst.msk [vmem:[%s2534_s7 + $0x158] sm:$0xff] %vm311_vm0, %v1169_v63 }
 0x477   :  { %v1202_v57 = vpop.trf.xlu1 }
 0x478   :  { %v1170_v27 = vpop.trf.xlu0  ;;  %1266 = vst.msk [vmem:[%s2534_s7 + $0x1e0] sm:$0xff] %vm311_vm0, %v1202_v57 }
 0x479   :  { %1250 = vst.msk [vmem:[%s2534_s7 + $0x160] sm:$0xff] %vm311_vm0, %v1170_v27 }
 0x47b   :  { %v1203_v8 = vpop.trf.xlu1 }
 0x47c   :  { %v1171_v44 = vpop.trf.xlu0  ;;  %1267 = vst.msk [vmem:[%s2534_s7 + $0x1e8] sm:$0xff] %vm311_vm0, %v1203_v8 }
 0x47d   :  { %1251 = vst.msk [vmem:[%s2534_s7 + $0x168] sm:$0xff] %vm311_vm0, %v1171_v44 }
 0x47f   :  { %v1204_v1 = vpop.trf.xlu1 }
 0x480   :  { %v1172_v7 = vpop.trf.xlu0  ;;  %1268 = vst.msk [vmem:[%s2534_s7 + $0x1f0] sm:$0xff] %vm311_vm0, %v1204_v1 }
 0x481   :  { %1252 = vst.msk [vmem:[%s2534_s7 + $0x170] sm:$0xff] %vm311_vm0, %v1172_v7 }
 0x483   :  { %v1205_v39 = vpop.trf.xlu1 }
 0x484   :  { %v1173_v38 = vpop.trf.xlu0  ;;  %1269 = vst.msk [vmem:[%s2534_s7 + $0x1f8] sm:$0xff] %vm311_vm0, %v1205_v39 }
 0x485   :  { %1253 = vst.msk [vmem:[%s2534_s7 + $0x178] sm:$0xff] %vm311_vm0, %v1173_v38 }

</bundles_post_ra>
